<compile_context>
chip_gen: v6e
topology: v6e:2x2x1
jax: 0.10.0
libtpu: 0.0.40
codegen_flags: <defaults>
</compile_context>

<pallas_src>
import functools

import jax
import jax.numpy as jnp
from jax.experimental import pallas as pl
from jax.experimental.pallas import tpu as pltpu

OUT_W = 128  # lane-dense output slab width (must be >= action_dim + 2)


# ----------------------------------------------------------------------------
# Pallas kernel
# ----------------------------------------------------------------------------
def _ppo_fused_kernel(state_ref, w1_ref, b1_ref, w2_ref, b2_ref, w3_ref, b3_ref,
                      out_ref, *, action_dim):
    a = action_dim
    x = state_ref[...].astype(jnp.float32)

    # Fused policy|value MLP: 3 matmuls total (policy half = cols 0:64 of the
    # hidden, value half = cols 64:128; W2 is block-diagonal).
    h = jnp.dot(x, w1_ref[...], preferred_element_type=jnp.float32) + b1_ref[...]
    h = jnp.maximum(h, 0.0)
    h = jnp.dot(h, w2_ref[...], preferred_element_type=jnp.float32) + b2_ref[...]
    h = jnp.maximum(h, 0.0)
    raw = jnp.dot(h, w3_ref[...], preferred_element_type=jnp.float32) + b3_ref[...]

    pol = raw[:, :a]           # policy head raw outputs (cols 0:A)
    value = raw[:, a:a + 1]    # value head output (col A)

    # logits = F.softmax(pol, dim=-1)   (yes, the module really does this)
    m = jnp.max(pol, axis=-1, keepdims=True)
    e = jnp.exp(pol - m)
    p = e * pl.reciprocal(jnp.sum(e, axis=-1, keepdims=True), approx=True)

    # Categorical(logits=p): log_probs = p - logsumexp(p, -1).
    # p is in [0, 1], so no max-subtraction is needed (exp(p) <= e).
    lse = jnp.log(jnp.sum(jnp.exp(p), axis=-1, keepdims=True))
    log_probs = p - lse
    entropy = -jnp.sum(jnp.exp(log_probs) * log_probs, axis=-1, keepdims=True)

    # Lane-dense output slab: [log_probs | entropy | value | 0-pad].
    out_ref[...] = jnp.zeros_like(out_ref)
    out_ref[:, :a] = log_probs
    out_ref[:, a:a + 1] = entropy
    out_ref[:, a + 1:a + 2] = value


# ----------------------------------------------------------------------------
# Wrapper: batch-tiled pallas_call
# ----------------------------------------------------------------------------
@functools.partial(jax.jit, static_argnames=("action_dim", "block_rows"))
def ppo_forward_core(state, packed, *, action_dim, block_rows=128):
    """Runs the fused policy/value kernel.

    Returns a (B, OUT_W) slab: cols [0:A) log_probs, col A entropy,
    col A+1 value."""
    b, s = state.shape
    two_h = packed["w1"].shape[1]
    assert block_rows % 8 == 0, "block_rows must be a multiple of 8"
    assert action_dim + 2 <= OUT_W, "action_dim too large for output slab"

    num_tiles = pl.cdiv(b, block_rows)
    padded_b = num_tiles * block_rows
    if padded_b != b:
        state = jnp.pad(state, ((0, padded_b - b), (0, 0)))

    kernel = functools.partial(_ppo_fused_kernel, action_dim=action_dim)

    slab = pl.pallas_call(
        kernel,
        grid=(num_tiles,),
        in_specs=[
            # state: one batch tile per grid step
            pl.BlockSpec((block_rows, s), lambda i: (i, 0)),
            # packed weights / biases: constant block index -> VMEM-resident
            pl.BlockSpec((s, two_h), lambda i: (0, 0)),
            pl.BlockSpec((1, two_h), lambda i: (0, 0)),
            pl.BlockSpec((two_h, two_h), lambda i: (0, 0)),
            pl.BlockSpec((1, two_h), lambda i: (0, 0)),
            pl.BlockSpec((two_h, OUT_W), lambda i: (0, 0)),
            pl.BlockSpec((1, OUT_W), lambda i: (0, 0)),
        ],
        out_specs=pl.BlockSpec((block_rows, OUT_W), lambda i: (i, 0)),
        out_shape=jax.ShapeDtypeStruct((padded_b, OUT_W), jnp.float32),
        compiler_params=pltpu.CompilerParams(
            dimension_semantics=("parallel",),
        ),
    )(state, packed["w1"], packed["b1"], packed["w2"], packed["b2"],
      packed["w3"], packed["b3"])

    return slab[:b]


def ppo_agent_forward(state, packed_params, action_dim, action=None, key=None,
                      block_rows=128):
    """Mirrors PPOAgent.forward: returns (action, logprob, entropy, value)."""
    slab = ppo_forward_core(state, packed_params, action_dim=action_dim,
                            block_rows=block_rows)
    log_probs = slab[:, :action_dim]
    entropy = slab[:, action_dim]
    value = slab[:, action_dim + 1:action_dim + 2]

    if action is None:
        # TODO(synk): PyTorch's Categorical.sample RNG stream cannot be
        # reproduced bit-exactly; jax.random.categorical on the same
        # normalized log-probs is used instead.
        action = jax.random.categorical(key, log_probs, axis=-1)

    # TODO(synk): for the update path (action provided) the per-row gather
    # could be fused into the kernel (one-hot select) to avoid emitting the
    # full log_probs block; kept outside for a single kernel variant.
    logprob = jnp.take_along_axis(log_probs, action[:, None], axis=-1)[:, 0]
    return action, logprob, entropy, value


# ----------------------------------------------------------------------------
# Parameter init (PyTorch nn.Linear-style uniform) + packing for the kernel
# ----------------------------------------------------------------------------
def _init_linear(key, fan_in, fan_out):
    kw, kb = jax.random.split(key)
    bound = 1.0 / jnp.sqrt(jnp.float32(fan_in))
    w = jax.random.uniform(kw, (fan_in, fan_out), jnp.float32, -bound, bound)
    b = jax.random.uniform(kb, (1, fan_out), jnp.float32, -bound, bound)
    return w, b


def init_ppo_params(key, state_dim, action_dim, hidden_dim=64):
    keys = jax.random.split(key, 6)
    pw1, pb1 = _init_linear(keys[0], state_dim, hidden_dim)
    pw2, pb2 = _init_linear(keys[1], hidden_dim, hidden_dim)
    pw3, pb3 = _init_linear(keys[2], hidden_dim, action_dim)
    vw1, vb1 = _init_linear(keys[3], state_dim, hidden_dim)
    vw2, vb2 = _init_linear(keys[4], hidden_dim, hidden_dim)
    vw3, vb3 = _init_linear(keys[5], hidden_dim, 1)
    return dict(
        pw1=pw1, pb1=pb1, pw2=pw2, pb2=pb2, pw3=pw3, pb3=pb3,
        vw1=vw1, vb1=vb1, vw2=vw2, vb2=vb2, vw3=vw3, vb3=vb3,
    )


def pack_ppo_params(params, action_dim):
    """Pack separate policy/value weights into 3 fused, lane-padded matrices."""
    pw1, vw1 = params["pw1"], params["vw1"]
    _, h = pw1.shape
    a = action_dim

    w1 = jnp.concatenate([pw1, vw1], axis=1)                        # (S, 2H)
    b1 = jnp.concatenate([params["pb1"], params["vb1"]], axis=1)    # (1, 2H)

    w2 = jnp.zeros((2 * h, 2 * h), jnp.float32)
    w2 = w2.at[:h, :h].set(params["pw2"]).at[h:, h:].set(params["vw2"])
    b2 = jnp.concatenate([params["pb2"], params["vb2"]], axis=1)    # (1, 2H)

    # Layer 3 packed & padded to OUT_W lanes: policy raw -> cols 0:A,
    # value -> col A, remaining columns exactly zero.
    w3 = jnp.zeros((2 * h, OUT_W), jnp.float32)
    w3 = w3.at[:h, :a].set(params["pw3"]).at[h:, a:a + 1].set(params["vw3"])
    b3 = jnp.zeros((1, OUT_W), jnp.float32)
    b3 = b3.at[:, :a].set(params["pb3"]).at[:, a:a + 1].set(params["vb3"])

    return dict(w1=w1, b1=b1, w2=w2, b2=b2, w3=w3, b3=b3)


# ----------------------------------------------------------------------------
# Pure-JAX reference (for the sanity check)
# ----------------------------------------------------------------------------
def _ref_forward(state, params):
    def mlp(x, w1, b1, w2, b2, w3, b3):
        h = jnp.maximum(x @ w1 + b1, 0.0)
        h = jnp.maximum(h @ w2 + b2, 0.0)
        return h @ w3 + b3

    raw = mlp(state, params["pw1"], params["pb1"], params["pw2"],
              params["pb2"], params["pw3"], params["pb3"])
    p = jax.nn.softmax(raw, axis=-1)
    log_probs = p - jax.scipy.special.logsumexp(p, axis=-1, keepdims=True)
    entropy = -jnp.sum(jnp.exp(log_probs) * log_probs, axis=-1)
    value = mlp(state, params["vw1"], params["vb1"], params["vw2"],
                params["vb2"], params["vw3"], params["vb3"])
    return log_probs, entropy, value


if __name__ == "__main__":
    STATE_DIM = 8
    ACTION_DIM = 4
    HIDDEN = 64
    BATCH = 256
    BLOCK_ROWS = 128   # batch tile: grid=(2,) at this batch size

    root = jax.random.PRNGKey(0)
    k_params, k_state, k_sample = jax.random.split(root, 3)

    params = init_ppo_params(k_params, STATE_DIM, ACTION_DIM, HIDDEN)
    packed = pack_ppo_params(params, ACTION_DIM)
    state = jax.random.normal(k_state, (BATCH, STATE_DIM), jnp.float32)

    # Sampling path (rollout collection).
    action, logprob, entropy, value = ppo_agent_forward(
        state, packed, ACTION_DIM, action=None, key=k_sample,
        block_rows=BLOCK_ROWS)
    jax.block_until_ready((action, logprob, entropy, value))

    # Provided-action path (PPO update).
    fixed_action = jnp.arange(BATCH, dtype=jnp.int32) % ACTION_DIM
    action2, logprob2, entropy2, value2 = ppo_agent_forward(
        state, packed, ACTION_DIM, action=fixed_action, block_rows=BLOCK_ROWS)
    jax.block_until_ready((action2, logprob2, entropy2, value2))

    # Sanity check against pure-JAX reference.  Tolerance is set by the
    # approx reciprocal in the softmax (~2^-12 relative), not the fusion.
    ref_logp, ref_ent, ref_val = _ref_forward(state, params)
    ref_lp_gather = jnp.take_along_axis(ref_logp, fixed_action[:, None], -1)[:, 0]
    assert jnp.allclose(logprob2, ref_lp_gather, atol=2e-3), "logprob mismatch"
    assert jnp.allclose(entropy2, ref_ent, atol=2e-3), "entropy mismatch"
    assert jnp.allclose(value2, ref_val, atol=1e-4), "value mismatch"
    assert action.shape == (BATCH,) and value.shape == (BATCH, 1)
    assert logprob.shape == (BATCH,) and entropy.shape == (BATCH,)

    print("KERNEL_OK")
</pallas_src>

<mosaic_0001>
module attributes {stable_mosaic.version = 11 : i64} {
  func.func @_ppo_fused_kernel(%arg0: i32, %arg1: memref<128x8xf32, #tpu.memory_space<vmem>>, %arg2: memref<8x128xf32, #tpu.memory_space<vmem>>, %arg3: memref<1x128xf32, #tpu.memory_space<vmem>>, %arg4: memref<128x128xf32, #tpu.memory_space<vmem>>, %arg5: memref<1x128xf32, #tpu.memory_space<vmem>>, %arg6: memref<128x128xf32, #tpu.memory_space<vmem>>, %arg7: memref<1x128xf32, #tpu.memory_space<vmem>>, %arg8: memref<128x128xf32, #tpu.memory_space<vmem>>) attributes {dimension_semantics = [#tpu.dimension_semantics<parallel>], iteration_bounds = array<i64: 2>, scalar_prefetch = 0 : i64, scratch_operands = 0 : i64, tpu.core_type = #tpu.core_type<tc>, window_params = [{transform_indices = @transform_0, window_bounds = array<i64: 128, 8>}, {pipeline_mode = #tpu.pipeline_mode<synchronous>, transform_indices = @transform_1, window_bounds = array<i64: 8, 128>}, {pipeline_mode = #tpu.pipeline_mode<synchronous>, transform_indices = @transform_2, window_bounds = array<i64: 1, 128>}, {pipeline_mode = #tpu.pipeline_mode<synchronous>, transform_indices = @transform_3, window_bounds = array<i64: 128, 128>}, {pipeline_mode = #tpu.pipeline_mode<synchronous>, transform_indices = @transform_4, window_bounds = array<i64: 1, 128>}, {pipeline_mode = #tpu.pipeline_mode<synchronous>, transform_indices = @transform_5, window_bounds = array<i64: 128, 128>}, {pipeline_mode = #tpu.pipeline_mode<synchronous>, transform_indices = @transform_6, window_bounds = array<i64: 1, 128>}, {transform_indices = @transform_7, window_bounds = array<i64: 128, 128>}]} {
    %c0 = arith.constant 0 : index
    %c0_0 = arith.constant 0 : index
    %0 = vector.load %arg1[%c0, %c0_0] : memref<128x8xf32, #tpu.memory_space<vmem>>, vector<128x8xf32>
    %c0_1 = arith.constant 0 : index
    %c0_2 = arith.constant 0 : index
    %1 = vector.load %arg2[%c0_1, %c0_2] : memref<8x128xf32, #tpu.memory_space<vmem>>, vector<8x128xf32>
    %cst = arith.constant dense<0.000000e+00> : vector<128x128xf32>
    %2 = tpu.matmul %0, %1, %cst {dimension_numbers = #tpu.dot_dimension_numbers<[1], [0], [0], [1], [0, 0, 1, 1], [], []>} : vector<128x8xf32>, vector<8x128xf32>, vector<128x128xf32> -> vector<128x128xf32>
    %c0_3 = arith.constant 0 : index
    %c0_4 = arith.constant 0 : index
    %3 = vector.load %arg3[%c0_3, %c0_4] : memref<1x128xf32, #tpu.memory_space<vmem>>, vector<1x128xf32>
    %4 = vector.broadcast %3 : vector<1x128xf32> to vector<128x128xf32>
    %5 = arith.addf %2, %4 : vector<128x128xf32>
    %cst_5 = arith.constant 0.000000e+00 : f32
    %6 = vector.broadcast %cst_5 : f32 to vector<128x128xf32>
    %7 = arith.maximumf %5, %6 : vector<128x128xf32>
    %c0_6 = arith.constant 0 : index
    %c0_7 = arith.constant 0 : index
    %8 = vector.load %arg4[%c0_6, %c0_7] : memref<128x128xf32, #tpu.memory_space<vmem>>, vector<128x128xf32>
    %cst_8 = arith.constant dense<0.000000e+00> : vector<128x128xf32>
    %9 = tpu.matmul %7, %8, %cst_8 {dimension_numbers = #tpu.dot_dimension_numbers<[1], [0], [0], [1], [0, 0, 1, 1], [], []>} : vector<128x128xf32>, vector<128x128xf32>, vector<128x128xf32> -> vector<128x128xf32>
    %c0_9 = arith.constant 0 : index
    %c0_10 = arith.constant 0 : index
    %10 = vector.load %arg5[%c0_9, %c0_10] : memref<1x128xf32, #tpu.memory_space<vmem>>, vector<1x128xf32>
    %11 = vector.broadcast %10 : vector<1x128xf32> to vector<128x128xf32>
    %12 = arith.addf %9, %11 : vector<128x128xf32>
    %cst_11 = arith.constant 0.000000e+00 : f32
    %13 = vector.broadcast %cst_11 : f32 to vector<128x128xf32>
    %14 = arith.maximumf %12, %13 : vector<128x128xf32>
    %c0_12 = arith.constant 0 : index
    %c0_13 = arith.constant 0 : index
    %15 = vector.load %arg6[%c0_12, %c0_13] : memref<128x128xf32, #tpu.memory_space<vmem>>, vector<128x128xf32>
    %cst_14 = arith.constant dense<0.000000e+00> : vector<128x128xf32>
    %16 = tpu.matmul %14, %15, %cst_14 {dimension_numbers = #tpu.dot_dimension_numbers<[1], [0], [0], [1], [0, 0, 1, 1], [], []>} : vector<128x128xf32>, vector<128x128xf32>, vector<128x128xf32> -> vector<128x128xf32>
    %c0_15 = arith.constant 0 : index
    %c0_16 = arith.constant 0 : index
    %17 = vector.load %arg7[%c0_15, %c0_16] : memref<1x128xf32, #tpu.memory_space<vmem>>, vector<1x128xf32>
    %18 = vector.broadcast %17 : vector<1x128xf32> to vector<128x128xf32>
    %19 = arith.addf %16, %18 : vector<128x128xf32>
    %20 = vector.extract_strided_slice %19 {offsets = [0, 0], sizes = [128, 4], strides = [1, 1]} : vector<128x128xf32> to vector<128x4xf32>
    %21 = vector.extract_strided_slice %19 {offsets = [0, 4], sizes = [128, 1], strides = [1, 1]} : vector<128x128xf32> to vector<128x1xf32>
    %cst_17 = arith.constant dense<0xFF800000> : vector<128xf32>
    %22 = vector.multi_reduction <maximumf>, %20, %cst_17 [1] : vector<128x4xf32> to vector<128xf32>
    %23 = vector.shape_cast %22 : vector<128xf32> to vector<128x1xf32>
    %24 = vector.broadcast %23 : vector<128x1xf32> to vector<128x4xf32>
    %25 = arith.subf %20, %24 : vector<128x4xf32>
    %26 = math.exp %25 : vector<128x4xf32>
    %cst_18 = arith.constant dense<0.000000e+00> : vector<128xf32>
    %27 = vector.multi_reduction <add>, %26, %cst_18 [1] : vector<128x4xf32> to vector<128xf32>
    %28 = vector.shape_cast %27 : vector<128xf32> to vector<128x1xf32>
    %29 = tpu.reciprocal %28 {approx = true} : vector<128x1xf32> -> vector<128x1xf32>
    %30 = vector.broadcast %29 : vector<128x1xf32> to vector<128x4xf32>
    %31 = arith.mulf %26, %30 : vector<128x4xf32>
    %32 = math.exp %31 : vector<128x4xf32>
    %cst_19 = arith.constant dense<0.000000e+00> : vector<128xf32>
    %33 = vector.multi_reduction <add>, %32, %cst_19 [1] : vector<128x4xf32> to vector<128xf32>
    %34 = vector.shape_cast %33 : vector<128xf32> to vector<128x1xf32>
    %35 = math.log %34 : vector<128x1xf32>
    %36 = vector.broadcast %35 : vector<128x1xf32> to vector<128x4xf32>
    %37 = arith.subf %31, %36 : vector<128x4xf32>
    %38 = math.exp %37 : vector<128x4xf32>
    %39 = arith.mulf %38, %37 : vector<128x4xf32>
    %cst_20 = arith.constant dense<0.000000e+00> : vector<128xf32>
    %40 = vector.multi_reduction <add>, %39, %cst_20 [1] : vector<128x4xf32> to vector<128xf32>
    %41 = vector.shape_cast %40 : vector<128xf32> to vector<128x1xf32>
    %cst_21 = arith.constant 0.000000e+00 : f32
    %42 = vector.broadcast %cst_21 : f32 to vector<128x1xf32>
    %43 = arith.subf %42, %41 : vector<128x1xf32>
    %cst_22 = arith.constant 0.000000e+00 : f32
    %44 = vector.broadcast %cst_22 : f32 to vector<128x128xf32>
    %c0_23 = arith.constant 0 : index
    %c0_24 = arith.constant 0 : index
    %45 = vector.load %arg8[%c0_23, %c0_24] : memref<128x128xf32, #tpu.memory_space<vmem>>, vector<128x128xf32>
    tpu.vector_store %arg8[%c0_23, %c0_24], %44 {strides = array<i32>} : memref<128x128xf32, #tpu.memory_space<vmem>>, vector<128x128xf32>,
    %c0_25 = arith.constant 0 : index
    %c0_26 = arith.constant 0 : index
    %46 = vector.load %arg8[%c0_25, %c0_26] : memref<128x128xf32, #tpu.memory_space<vmem>>, vector<128x4xf32>
    tpu.vector_store %arg8[%c0_25, %c0_26], %37 {strides = array<i32>} : memref<128x128xf32, #tpu.memory_space<vmem>>, vector<128x4xf32>,
    %c0_27 = arith.constant 0 : index
    %c4 = arith.constant 4 : index
    %47 = vector.load %arg8[%c0_27, %c4] : memref<128x128xf32, #tpu.memory_space<vmem>>, vector<128x1xf32>
    tpu.vector_store %arg8[%c0_27, %c4], %43 {strides = array<i32>} : memref<128x128xf32, #tpu.memory_space<vmem>>, vector<128x1xf32>,
    %c0_28 = arith.constant 0 : index
    %c5 = arith.constant 5 : index
    %48 = vector.load %arg8[%c0_28, %c5] : memref<128x128xf32, #tpu.memory_space<vmem>>, vector<128x1xf32>
    tpu.vector_store %arg8[%c0_28, %c5], %21 {strides = array<i32>} : memref<128x128xf32, #tpu.memory_space<vmem>>, vector<128x1xf32>,
    return
  }
  func.func @transform_0(%arg0: i32) -> (i32, i32) {
    %c0_i32 = arith.constant 0 : i32
    %c0_i32_0 = arith.constant 0 : i32
    return %arg0, %c0_i32 : i32, i32
  }
  func.func @transform_1(%arg0: i32) -> (i32, i32) {
    %c0_i32 = arith.constant 0 : i32
    %c0_i32_0 = arith.constant 0 : i32
    %c0_i32_1 = arith.constant 0 : i32
    return %c0_i32, %c0_i32_0 : i32, i32
  }
  func.func @transform_2(%arg0: i32) -> (i32, i32) {
    %c0_i32 = arith.constant 0 : i32
    %c0_i32_0 = arith.constant 0 : i32
    %c0_i32_1 = arith.constant 0 : i32
    return %c0_i32, %c0_i32_0 : i32, i32
  }
  func.func @transform_3(%arg0: i32) -> (i32, i32) {
    %c0_i32 = arith.constant 0 : i32
    %c0_i32_0 = arith.constant 0 : i32
    %c0_i32_1 = arith.constant 0 : i32
    return %c0_i32, %c0_i32_0 : i32, i32
  }
  func.func @transform_4(%arg0: i32) -> (i32, i32) {
    %c0_i32 = arith.constant 0 : i32
    %c0_i32_0 = arith.constant 0 : i32
    %c0_i32_1 = arith.constant 0 : i32
    return %c0_i32, %c0_i32_0 : i32, i32
  }
  func.func @transform_5(%arg0: i32) -> (i32, i32) {
    %c0_i32 = arith.constant 0 : i32
    %c0_i32_0 = arith.constant 0 : i32
    %c0_i32_1 = arith.constant 0 : i32
    return %c0_i32, %c0_i32_0 : i32, i32
  }
  func.func @transform_6(%arg0: i32) -> (i32, i32) {
    %c0_i32 = arith.constant 0 : i32
    %c0_i32_0 = arith.constant 0 : i32
    %c0_i32_1 = arith.constant 0 : i32
    return %c0_i32, %c0_i32_0 : i32, i32
  }
  func.func @transform_7(%arg0: i32) -> (i32, i32) {
    %c0_i32 = arith.constant 0 : i32
    %c0_i32_0 = arith.constant 0 : i32
    return %arg0, %c0_i32 : i32, i32
  }
}

</mosaic_0001>

<bundles_post_ra>
// kernel: ppo_forward_core.1
= control target key start
LH: loop header
LB: loop body
LE: loop exit
PB: predicated region body
PF: predicated region fallthrough
CT: control target
= control target key end

     0   :  { %12 = vsyncpa [#allocation3], 0  ;;  %s2763_s0 = inlined_call_operand.vmem [shape: f32[256,8], index: 0, kind: input, shape index: {}]   ;;  %s2764_s1 = inlined_call_operand.vmem [shape: f32[8,128], index: 1, kind: input, shape index: {}]   ;;  %s2765_s2 = inlined_call_operand.vmem [shape: f32[1,128], index: 2, kind: input, shape index: {}]   ;;  %s2766_s3 = inlined_call_operand.vmem [shape: f32[128,128], index: 3, kind: input, shape index: {}]   ;;  %s2767_s4 = inlined_call_operand.vmem [shape: f32[1,128], index: 4, kind: input, shape index: {}]   ;;  %s2768_s5 = inlined_call_operand.vmem [shape: f32[128,128], index: 5, kind: input, shape index: {}]   ;;  %s2769_s6 = inlined_call_operand.vmem [shape: f32[1,128], index: 6, kind: input, shape index: {}]   ;;  %s2770_s7 = inlined_call_operand.hbm [shape: f32[256,128], index: 7, kind: output, shape index: {}]  }
   0x1   :  { %14 = vsyncpa [#allocation3 + $0x1], 0  ;;  %s2050_s24 = smov 0   ;;  %s2052_s25 = smov 0  }
   0x2   :  { %s2054_s26 = smov 0   ;;  %s2056_s27 = smov 0  }
   0x3 LB: > { %s2071_s28 = sadd.s32 4294967295, %s2003_s27   ;;  %s1489_s29 = sadd.s32 4294967294, %s2003_s27   ;;  %s2003_s27 = sphi %s2056_s27, %s2776_s27   ;;  %s1999_s26 = sphi %s2054_s26, %s2775_s26   ;;  %s1995_s25 = sphi %s2052_s25, %s2774_s25   ;;  %s1991_s24 = sphi %s2050_s24, %s2773_s24  }
   0x4   : > { %s2075_s30 = sadd.s32 1, %s2003_s27   ;;  %s179_s8 = sadd.s32 1, %s1999_s26 }
   0x5   : > { %s176_s9 = ssub.s32 %s2003_s27, %s2075_s30  ;;  %p189_p0 = scmp.ne.s32.totalorder %s1999_s26, %s1995_s25 }
   0x6   : > { %p177_p1 = scmp.eq.s32.totalorder %s176_s9, 0  ;;  %p190_p2 = scmp.eq.s32.totalorder %s2071_s28, 1 }
   0x7   : > { %p195_p3 = scmp.ne.s32.totalorder %s1995_s25, %s1991_s24  ;;  %p196_p4 = scmp.eq.s32.totalorder %s1489_s29, 1 }
   0x8   : > { %s2086_s10 = scalar_select %p177_p1, %s1999_s26, %s179_s8  }
   0x9   : > { %p2088_p5 = por %p190_p2, %p189_p0  ;;  %p2092_p6 = por %p196_p4, %p195_p3 }
   0xa   : > { %p1492_p7 = scmp.ge.s32.totalorder %s2003_s27, 1  ;;  %p241_p8 = scmp.lt.s32.totalorder %s2003_s27, 3 }
   0xc   : > { %p242_p9 = pnand %p1492_p7, %p241_p8 }
   0xd   : > { %s1494_s15 = sshll.u32 (!%p242_p9), %s2071_s28, 4  ;;  %s2005_s21 = smov (!%p242_p9), 1  }
   0xe   : > { %245 = sbr.rel (%p242_p9) target bundleno = 1314 (0x522), region = 48  ;;  %p274_p10 = scmp.lt.s32.totalorder (!%p242_p9), %s1494_s15, 31 }
   0xf   : > { %s270_s22 = sand.u32 (!%p242_p9), 1, %s1995_s25   ;;  %s2007_s17 = smov (!%p242_p9), [#allocation2]  }
  0x10   : > { %s1947_s18 = sshll.u32 (!%p242_p9), %s2007_s17, 4  ;;  %s1948_s18 = int_to_ptr.vmem [resolvable:$false] %s1947_s18 }
  0x11   : > { %s1949_s19 = scalar_lea.vmem (!%p242_p9), %s1948_s18, 4096 }
  0x13   : > { %v296_v0 = vld [vmem:[%s2764_s1] sm:$0xff]  ;;  %v529_v1 = vld [vmem:[%s2766_s3 + $0x78] sm:$0xff]  ;;  %v528_v2 = vld [vmem:[%s2766_s3 + $0x70] sm:$0xff]  ;;  %s2778_s15 = smov (!%p274_p10, %s1494_s15), 31  ;;  %vm304_vm0 = vcmask 64512   ;;  %vm866_vm1 = vcmask 31744  }
  0x14   : > { %1602 = vmatprep.subr.mxu0 %v296_v0  ;;  %1628 = vmatprep.subr.mxu1 %v529_v1  ;;  %v527_v3 = vld [vmem:[%s2766_s3 + $0x68] sm:$0xff]  ;;  %v526_v4 = vld [vmem:[%s2766_s3 + $0x60] sm:$0xff]  ;;  %s1495_s29 = sshll.u32 %s2778_s15, 3  ;;  %v525_v5 = vld [vmem:[%s2766_s3 + $0x58] sm:$0xff]  ;;  %vm1315_vm2 = vcmask 39968   ;;  %vm1396_vm3 = vcmask 48168  }
  0x15   : > { %1603 = vmatpush3.msra.mxu0 %v296_v0  ;;  %1629 = vmatpush3.msra.mxu1 %v529_v1  ;;  %s2117_s13 = scalar_lea.vmem %s2763_s0, %s1495_s29  ;;  %v524_v9 = vld [vmem:[%s2766_s3 + $0x50] sm:$0xff]  ;;  %v523_v11 = vld [vmem:[%s2766_s3 + $0x48] sm:$0xff]  ;;  %v522_v13 = vld [vmem:[%s2766_s3 + $0x40] sm:$0xff]  ;;  %s1520_s29 = sshll.u32 %s2071_s28, 11 }
  0x16   : > { %1630 = vmatprep.subr.mxu1 %v528_v2  ;;  %v280_v6 = vld [vmem:[%s2117_s13] sm:$0xff]  ;;  %v281_v7 = vld [vmem:[%s2117_s13 + $0x8] sm:$0xff]  ;;  %v282_v8 = vld [vmem:[%s2117_s13 + $0x10] sm:$0xff]  ;;  %s2711_s16 = scalar_lea.hbm %s2770_s7, %s1520_s29  ;;  %s2723_s28 = scalar_lea.sflag [#allocation3], %s270_s22 }
  0x17   : > { %1631 = vmatpush3.msra.mxu1 %v528_v2  ;;  %1604 = vmatprep.mubr.msk.f32.mxu0 %vm304_vm0, %v280_v6  ;;  %v283_v10 = vld [vmem:[%s2117_s13 + $0x18] sm:$0xff]  ;;  %v284_v12 = vld [vmem:[%s2117_s13 + $0x20] sm:$0xff]  ;;  %v285_v14 = vld [vmem:[%s2117_s13 + $0x28] sm:$0xff] }
  0x18   : > { %1632 = vmatprep.subr.mxu1 %v527_v3  ;;  %1605 = vmatmul.mubr.msk.f32.vlgmr.msra.gmra.mxu0 %vm304_vm0, %v281_v7  ;;  %v521_v15 = vld [vmem:[%s2766_s3 + $0x38] sm:$0xff]  ;;  %v286_v16 = vld [vmem:[%s2117_s13 + $0x30] sm:$0xff]  ;;  %v519_v19 = vld [vmem:[%s2766_s3 + $0x28] sm:$0xff] }
  0x19   : > { %1633 = vmatpush3.msra.mxu1 %v527_v3  ;;  %1607 = vmatprep.mubr.msk.f32.mxu0 %vm304_vm0, %v282_v8  ;;  %v520_v17 = vld [vmem:[%s2766_s3 + $0x30] sm:$0xff]  ;;  %v287_v18 = vld [vmem:[%s2117_s13 + $0x38] sm:$0xff]  ;;  %v288_v20 = vld [vmem:[%s2117_s13 + $0x40] sm:$0xff] }
  0x1a   : > { %1634 = vmatprep.subr.mxu1 %v526_v4  ;;  %v518_v21 = vld [vmem:[%s2766_s3 + $0x20] sm:$0xff]  ;;  %v289_v22 = vld [vmem:[%s2117_s13 + $0x48] sm:$0xff]  ;;  %v290_v23 = vld [vmem:[%s2117_s13 + $0x50] sm:$0xff] }
  0x1b   : > { %1635 = vmatpush3.msra.mxu1 %v526_v4  ;;  %v291_v24 = vld [vmem:[%s2117_s13 + $0x58] sm:$0xff]  ;;  %v292_v25 = vld [vmem:[%s2117_s13 + $0x60] sm:$0xff]  ;;  %v293_v26 = vld [vmem:[%s2117_s13 + $0x68] sm:$0xff] }
  0x1c   : > { %1636 = vmatprep.subr.mxu1 %v525_v5  ;;  %1608 = vmatmul.mubr.msk.f32.gmra.mxu0 %vm304_vm0, %v283_v10  ;;  %v294_v27 = vld [vmem:[%s2117_s13 + $0x70] sm:$0xff]  ;;  %v295_v28 = vld [vmem:[%s2117_s13 + $0x78] sm:$0xff]  ;;  %v515_v31 = vld [vmem:[%s2766_s3 + $0x8] sm:$0xff]  ;;  %s1493_s13 = sshll.u32 %s270_s22, 7 }
  0x1d   : > { %1637 = vmatpush3.msra.mxu1 %v525_v5  ;;  %1610 = vmatprep.mubr.msk.f32.mxu0 %vm304_vm0, %v284_v12  ;;  %v517_v29 = vld [vmem:[%s2766_s3 + $0x18] sm:$0xff]  ;;  %v516_v30 = vld [vmem:[%s2766_s3 + $0x10] sm:$0xff]  ;;  %v514_v32 = vld [vmem:[%s2766_s3] sm:$0xff]  ;;  %s2481_s23 = scalar_lea.vmem [#allocation2], %s1493_s13 }
  0x1e   : > { %1638 = vmatprep.subr.mxu1 %v524_v9  ;;  %v713_v33 = vld [vmem:[%s2768_s5 + $0x78] sm:$0xff]  ;;  %v712_v34 = vld [vmem:[%s2768_s5 + $0x70] sm:$0xff]  ;;  %v711_v35 = vld [vmem:[%s2768_s5 + $0x68] sm:$0xff]  ;;  %s1427_s8 = sshll.u32 %s2481_s23, 4  ;;  %s2713_s8 = int_to_ptr.vmem [resolvable:$true] %s1427_s8 }
  0x1f   : > { %1639 = vmatpush3.msra.mxu1 %v524_v9  ;;  %1684 = vmatprep.subr.mxu0 %v713_v33  ;;  %v710_v36 = vld [vmem:[%s2768_s5 + $0x60] sm:$0xff]  ;;  %v709_v37 = vld [vmem:[%s2768_s5 + $0x58] sm:$0xff]  ;;  %v708_v38 = vld [vmem:[%s2768_s5 + $0x50] sm:$0xff]  ;;  %s1943_s15 = scalar_lea.vmem %s2713_s8, 2048  ;;  %p1950_p0 = scmp.lt.s32.totalorder %s2713_s8, %s1948_s18 }
  0x20   : > { %1640 = vmatprep.subr.mxu1 %v523_v11  ;;  %1611 = vmatmul.mubr.msk.f32.gmra.mxu0 %vm304_vm0, %v285_v14  ;;  %v707_v39 = vld [vmem:[%s2768_s5 + $0x48] sm:$0xff]  ;;  %v706_v40 = vld [vmem:[%s2768_s5 + $0x40] sm:$0xff]  ;;  %v705_v41 = vld [vmem:[%s2768_s5 + $0x38] sm:$0xff]  ;;  %p1944_p11 = scmp.ne.s32.totalorder %s2713_s8, %s1943_s15  ;;  %p1951_p1 = scmp.lt.s32.totalorder %s1949_s19, %s1943_s15 }
  0x21   : > { %1641 = vmatpush3.msra.mxu1 %v523_v11  ;;  %1613 = vmatprep.mubr.msk.f32.mxu0 %vm304_vm0, %v286_v16  ;;  %v704_v42 = vld [vmem:[%s2768_s5 + $0x30] sm:$0xff]  ;;  %v703_v43 = vld [vmem:[%s2768_s5 + $0x28] sm:$0xff]  ;;  %v702_v44 = vld [vmem:[%s2768_s5 + $0x20] sm:$0xff] }
  0x22   : > { %1642 = vmatprep.subr.mxu1 %v522_v13  ;;  %1685 = vmatpush3.msra.mxu0 %v713_v33  ;;  %v701_v45 = vld [vmem:[%s2768_s5 + $0x18] sm:$0xff]  ;;  %v1496_v46 = vld [vmem:[%s2765_s2] ss:$0 sm:$0xff]  ;;  %p1945_p12 = pnand %p1944_p11, %p2088_p5  ;;  %p1952_p2 = por %p1951_p1, %p1950_p0 }
  0x23   : > { %1643 = vmatpush3.msra.mxu1 %v522_v13  ;;  %1686 = vmatprep.subr.mxu0 %v712_v34  ;;  %v698_v33 = vld [vmem:[%s2768_s5] sm:$0xff] }
  0x24   : > { %1644 = vmatprep.subr.mxu1 %v521_v15  ;;  %1614 = vmatmul.mubr.msk.f32.gmra.mxu0 %vm304_vm0, %v287_v18  ;;  %p1946_p13 = pneg %p1945_p12 }
  0x25   : > { %1645 = vmatpush3.msra.mxu1 %v521_v15  ;;  %1616 = vmatprep.mubr.msk.f32.mxu0 %vm304_vm0, %v288_v20 }
  0x26   : > { %1646 = vmatprep.subr.mxu1 %v520_v17  ;;  %1687 = vmatpush3.msra.mxu0 %v712_v34  ;;  %v1513_v34 = vld [vmem:[%s2767_s4] ss:$0 sm:$0xff]  ;;  %p1953_p3 = pnand %p1952_p2, %p1946_p13 }
  0x27   : > { %1647 = vmatpush3.msra.mxu1 %v520_v17  ;;  %1688 = vmatprep.subr.mxu0 %v711_v35 }
  0x28   : > { %1648 = vmatprep.subr.mxu1 %v519_v19  ;;  %1617 = vmatmul.mubr.msk.f32.gmra.mxu0 %vm304_vm0, %v289_v22 }
  0x29   : > { %1649 = vmatpush3.msra.mxu1 %v519_v19  ;;  %1619 = vmatprep.mubr.msk.f32.mxu0 %vm304_vm0, %v290_v23 }
  0x2a   : > { %1650 = vmatprep.subr.mxu1 %v518_v21  ;;  %1689 = vmatpush3.msra.mxu0 %v711_v35 }
  0x2b   : > { %1651 = vmatpush3.msra.mxu1 %v518_v21  ;;  %1690 = vmatprep.subr.mxu0 %v710_v36 }
  0x2c   : > { %1620 = vmatmul.mubr.msk.f32.gmra.mxu0 %vm304_vm0, %v291_v24  ;;  %1652 = vmatprep.subr.mxu1 %v517_v29 }
  0x2d   : > { %1622 = vmatprep.mubr.msk.f32.mxu0 %vm304_vm0, %v292_v25  ;;  %1653 = vmatpush3.msra.mxu1 %v517_v29 }
  0x2e   : > { %1654 = vmatprep.subr.mxu1 %v516_v30  ;;  %1691 = vmatpush3.msra.mxu0 %v710_v36 }
  0x2f   : > { %1655 = vmatpush3.msra.mxu1 %v516_v30  ;;  %1692 = vmatprep.subr.mxu0 %v709_v37 }
  0x30   : > { %1623 = vmatmul.mubr.msk.f32.gmra.mxu0 %vm304_vm0, %v293_v26  ;;  %1656 = vmatprep.subr.mxu1 %v515_v31 }
  0x31   : > { %1625 = vmatprep.mubr.msk.f32.mxu0 %vm304_vm0, %v294_v27  ;;  %1657 = vmatpush3.msra.mxu1 %v515_v31  ;;  %v700_v31 = vld [vmem:[%s2768_s5 + $0x10] sm:$0xff] }
  0x32   : > { %1658 = vmatprep.subr.mxu1 %v514_v32  ;;  %1693 = vmatpush3.msra.mxu0 %v709_v37 }
  0x33   : > { %1659 = vmatpush3.msra.mxu1 %v514_v32  ;;  %1694 = vmatprep.subr.mxu0 %v708_v38  ;;  %v699_v32 = vld [vmem:[%s2768_s5 + $0x8] sm:$0xff] }
  0x34   : > { %1626 = vmatmul.mubr.msk.f32.gmra.mxu0 %vm304_vm0, %v295_v28 }
  0x35   : > { %1695 = vmatpush3.msra.mxu0 %v708_v38 }
  0x36   : > { %1696 = vmatprep.subr.mxu0 %v707_v39 }
  0x37   : > { %1697 = vmatpush3.msra.mxu0 %v707_v39 }
  0x38   : > { %1698 = vmatprep.subr.mxu0 %v706_v40 }
  0x39   : > { %1699 = vmatpush3.msra.mxu0 %v706_v40 }
  0x3a   : > { %1700 = vmatprep.subr.mxu0 %v705_v41 }
  0x3b   : > { %1701 = vmatpush3.msra.mxu0 %v705_v41 }
  0x3c   : > { %1702 = vmatprep.subr.mxu0 %v704_v42 }
  0x3d   : > { %1703 = vmatpush3.msra.mxu0 %v704_v42 }
  0x3e   : > { %1704 = vmatprep.subr.mxu0 %v703_v43 }
  0x3f   : > { %1705 = vmatpush3.msra.mxu0 %v703_v43 }
  0x40   : > { %1706 = vmatprep.subr.mxu0 %v702_v44 }
  0x41   : > { %1707 = vmatpush3.msra.mxu0 %v702_v44 }
  0x42   : > { %1708 = vmatprep.subr.mxu0 %v701_v45 }
  0x43   : > { %1709 = vmatpush3.msra.mxu0 %v701_v45 }
  0x44   : > { %1710 = vmatprep.subr.mxu0 %v700_v31 }
  0x45   : > { %1711 = vmatpush3.msra.mxu0 %v700_v31 }
  0x46   : > { %1712 = vmatprep.subr.mxu0 %v699_v32 }
  0x47   : > { %1713 = vmatpush3.msra.mxu0 %v699_v32 }
  0x48   : > { %1714 = vmatprep.subr.mxu0 %v698_v33 }
  0x49   : > { %1715 = vmatpush3.msra.mxu0 %v698_v33 }
  0xd8   : > { %v1606_v47 = vpop.f32.mrf.mxu0 }
  0xd9   : > { %v425_v48 = vadd.f32 %v1606_v47, %v1496_v46 }
  0xda   : > { %v419_v49 = vpop.f32.mrf.mxu0 }
  0xdb   : > { %v420_v50 = vadd.f32 %v1496_v46, %v419_v49  ;;  %v499_v53 = vmax.f32 %v425_v48, 0.0 }
  0xdc   : > { %v1609_v51 = vpop.f32.mrf.mxu0 }
  0xdd   : > { %v498_v52 = vmax.f32 %v420_v50, 0.0  ;;  %v435_v54 = vadd.f32 %v1609_v51, %v1496_v46 }
  0xde   : > { %v429_v55 = vpop.f32.mrf.mxu0 }
  0xdf   : > { %v430_v56 = vadd.f32 %v1496_v46, %v429_v55  ;;  %1660 = vmatprep.mubr.f32.mxu1 %v498_v52  ;;  %v501_v60 = vmax.f32 %v435_v54, 0.0 }
  0xe0   : > { %v1612_v57 = vpop.f32.mrf.mxu0  ;;  %1661 = vmatmul.mubr.f32.vlgmr.msra.gmra.mxu1 %v499_v53 }
  0xe1   : > { %v500_v58 = vmax.f32 %v430_v56, 0.0  ;;  %v445_v59 = vadd.f32 %v1612_v57, %v1496_v46 }
  0xe2   : > { %v439_v61 = vpop.f32.mrf.mxu0 }
  0xe3   : > { %v440_v62 = vadd.f32 %v1496_v46, %v439_v61  ;;  %1663 = vmatprep.mubr.f32.mxu1 %v500_v58  ;;  %v503_v63 = vmax.f32 %v445_v59, 0.0 }
  0xe4   : > { %v1615_v0 = vpop.f32.mrf.mxu0  ;;  %1664 = vmatmul.mubr.f32.gmra.mxu1 %v501_v60 }
  0xe5   : > { %v502_v1 = vmax.f32 %v440_v62, 0.0  ;;  %v455_v2 = vadd.f32 %v1615_v0, %v1496_v46 }
  0xe6   : > { %v449_v3 = vpop.f32.mrf.mxu0 }
  0xe7   : > { %v450_v4 = vadd.f32 %v1496_v46, %v449_v3  ;;  %1666 = vmatprep.mubr.f32.mxu1 %v502_v1  ;;  %v505_v5 = vmax.f32 %v455_v2, 0.0 }
  0xe8   : > { %v1618_v6 = vpop.f32.mrf.mxu0  ;;  %1667 = vmatmul.mubr.f32.gmra.mxu1 %v503_v63 }
  0xe9   : > { %v504_v7 = vmax.f32 %v450_v4, 0.0  ;;  %v465_v8 = vadd.f32 %v1618_v6, %v1496_v46 }
  0xea   : > { %v459_v9 = vpop.f32.mrf.mxu0 }
  0xeb   : > { %v460_v10 = vadd.f32 %v1496_v46, %v459_v9  ;;  %1669 = vmatprep.mubr.f32.mxu1 %v504_v7  ;;  %v507_v11 = vmax.f32 %v465_v8, 0.0 }
  0xec   : > { %v1621_v12 = vpop.f32.mrf.mxu0  ;;  %1670 = vmatmul.mubr.f32.gmra.mxu1 %v505_v5 }
  0xed   : > { %v506_v13 = vmax.f32 %v460_v10, 0.0  ;;  %v475_v14 = vadd.f32 %v1621_v12, %v1496_v46 }
  0xee   : > { %v469_v15 = vpop.f32.mrf.mxu0 }
  0xef   : > { %v470_v16 = vadd.f32 %v1496_v46, %v469_v15  ;;  %1672 = vmatprep.mubr.f32.mxu1 %v506_v13  ;;  %v509_v17 = vmax.f32 %v475_v14, 0.0 }
  0xf0   : > { %v1624_v18 = vpop.f32.mrf.mxu0  ;;  %1673 = vmatmul.mubr.f32.gmra.mxu1 %v507_v11 }
  0xf1   : > { %v508_v19 = vmax.f32 %v470_v16, 0.0  ;;  %v485_v20 = vadd.f32 %v1624_v18, %v1496_v46 }
  0xf2   : > { %v479_v21 = vpop.f32.mrf.mxu0 }
  0xf3   : > { %v480_v22 = vadd.f32 %v1496_v46, %v479_v21  ;;  %1675 = vmatprep.mubr.f32.mxu1 %v508_v19  ;;  %v511_v23 = vmax.f32 %v485_v20, 0.0  ;;  %v1514_v19 = vld [vmem:[%s2769_s6] ss:$0 sm:$0xff] }
  0xf4   : > { %v1627_v24 = vpop.f32.mrf.mxu0  ;;  %1676 = vmatmul.mubr.f32.gmra.mxu1 %v509_v17 }
  0xf5   : > { %v510_v25 = vmax.f32 %v480_v22, 0.0  ;;  %v495_v26 = vadd.f32 %v1627_v24, %v1496_v46 }
  0xf6   : > { %v489_v27 = vpop.f32.mrf.mxu0 }
  0xf7   : > { %v490_v28 = vadd.f32 %v1496_v46, %v489_v27  ;;  %1678 = vmatprep.mubr.f32.mxu1 %v510_v25  ;;  %v513_v29 = vmax.f32 %v495_v26, 0.0 }
  0xf8   : > { %1679 = vmatmul.mubr.f32.gmra.mxu1 %v511_v23 }
  0xf9   : > { %v512_v30 = vmax.f32 %v490_v28, 0.0 }
  0xfb   : > { %1681 = vmatprep.mubr.f32.mxu1 %v512_v30 }
  0xfc   : > { %1682 = vmatmul.mubr.f32.gmra.mxu1 %v513_v29 }
 0x1a0   : > { %v1662_v35 = vpop.f32.mrf.mxu1 }
 0x1a1   : > { %v609_v36 = vadd.f32 %v1662_v35, %v1513_v34 }
 0x1a2   : > { %v603_v37 = vpop.f32.mrf.mxu1 }
 0x1a3   : > { %v604_v38 = vadd.f32 %v1513_v34, %v603_v37  ;;  %v683_v41 = vmax.f32 %v609_v36, 0.0 }
 0x1a4   : > { %v1665_v39 = vpop.f32.mrf.mxu1 }
 0x1a5   : > { %v682_v40 = vmax.f32 %v604_v38, 0.0  ;;  %v619_v42 = vadd.f32 %v1665_v39, %v1513_v34 }
 0x1a6   : > { %v613_v43 = vpop.f32.mrf.mxu1 }
 0x1a7   : > { %v614_v44 = vadd.f32 %v1513_v34, %v613_v43  ;;  %1716 = vmatprep.mubr.f32.mxu0 %v682_v40  ;;  %v685_v47 = vmax.f32 %v619_v42, 0.0 }
 0x1a8   : > { %v1668_v45 = vpop.f32.mrf.mxu1  ;;  %1717 = vmatmul.mubr.f32.vlgmr.msra.gmra.mxu0 %v683_v41 }
 0x1a9   : > { %v684_v46 = vmax.f32 %v614_v44, 0.0  ;;  %v629_v48 = vadd.f32 %v1668_v45, %v1513_v34 }
 0x1aa   : > { %v623_v49 = vpop.f32.mrf.mxu1 }
 0x1ab   : > { %v624_v50 = vadd.f32 %v1513_v34, %v623_v49  ;;  %1719 = vmatprep.mubr.f32.mxu0 %v684_v46  ;;  %v687_v53 = vmax.f32 %v629_v48, 0.0 }
 0x1ac   : > { %v1671_v51 = vpop.f32.mrf.mxu1  ;;  %1720 = vmatmul.mubr.f32.gmra.mxu0 %v685_v47 }
 0x1ad   : > { %v686_v52 = vmax.f32 %v624_v50, 0.0  ;;  %v639_v54 = vadd.f32 %v1671_v51, %v1513_v34 }
 0x1ae   : > { %v633_v55 = vpop.f32.mrf.mxu1 }
 0x1af   : > { %v634_v56 = vadd.f32 %v1513_v34, %v633_v55  ;;  %1722 = vmatprep.mubr.f32.mxu0 %v686_v52  ;;  %v689_v59 = vmax.f32 %v639_v54, 0.0 }
 0x1b0   : > { %v1674_v57 = vpop.f32.mrf.mxu1  ;;  %1723 = vmatmul.mubr.f32.gmra.mxu0 %v687_v53 }
 0x1b1   : > { %v688_v58 = vmax.f32 %v634_v56, 0.0  ;;  %v649_v60 = vadd.f32 %v1674_v57, %v1513_v34 }
 0x1b2   : > { %v643_v61 = vpop.f32.mrf.mxu1 }
 0x1b3   : > { %v644_v62 = vadd.f32 %v1513_v34, %v643_v61  ;;  %1725 = vmatprep.mubr.f32.mxu0 %v688_v58  ;;  %v691_v1 = vmax.f32 %v649_v60, 0.0 }
 0x1b4   : > { %v1677_v63 = vpop.f32.mrf.mxu1  ;;  %1726 = vmatmul.mubr.f32.gmra.mxu0 %v689_v59 }
 0x1b5   : > { %v690_v0 = vmax.f32 %v644_v62, 0.0  ;;  %v659_v2 = vadd.f32 %v1677_v63, %v1513_v34 }
 0x1b6   : > { %v653_v3 = vpop.f32.mrf.mxu1 }
 0x1b7   : > { %v654_v4 = vadd.f32 %v1513_v34, %v653_v3  ;;  %1728 = vmatprep.mubr.f32.mxu0 %v690_v0  ;;  %v693_v7 = vmax.f32 %v659_v2, 0.0 }
 0x1b8   : > { %v1680_v5 = vpop.f32.mrf.mxu1  ;;  %1729 = vmatmul.mubr.f32.gmra.mxu0 %v691_v1 }
 0x1b9   : > { %v692_v6 = vmax.f32 %v654_v4, 0.0  ;;  %v669_v8 = vadd.f32 %v1680_v5, %v1513_v34 }
 0x1ba   : > { %v663_v9 = vpop.f32.mrf.mxu1 }
 0x1bb   : > { %v664_v10 = vadd.f32 %v1513_v34, %v663_v9  ;;  %1731 = vmatprep.mubr.f32.mxu0 %v692_v6  ;;  %v695_v13 = vmax.f32 %v669_v8, 0.0 }
 0x1bc   : > { %v1683_v11 = vpop.f32.mrf.mxu1  ;;  %1732 = vmatmul.mubr.f32.gmra.mxu0 %v693_v7 }
 0x1bd   : > { %v694_v12 = vmax.f32 %v664_v10, 0.0  ;;  %v679_v14 = vadd.f32 %v1683_v11, %v1513_v34 }
 0x1be   : > { %v673_v15 = vpop.f32.mrf.mxu1 }
 0x1bf   : > { %v674_v16 = vadd.f32 %v1513_v34, %v673_v15  ;;  %1734 = vmatprep.mubr.f32.mxu0 %v694_v12  ;;  %v697_v18 = vmax.f32 %v679_v14, 0.0 }
 0x1c0   : > { %1735 = vmatmul.mubr.f32.gmra.mxu0 %v695_v13 }
 0x1c1   : > { %v696_v17 = vmax.f32 %v674_v16, 0.0 }
 0x1c3   : > { %1737 = vmatprep.mubr.f32.mxu0 %v696_v17 }
 0x1c4   : > { %1738 = vmatmul.mubr.f32.gmra.mxu0 %v697_v18 }
 0x268   : > { %v1718_v20 = vpop.f32.mrf.mxu0 }
 0x269   : > { %v2244_v21 = vadd.f32 %v1718_v20, %v1514_v19 }
 0x26a   : > { %v787_v22 = vpop.f32.mrf.mxu0 }
 0x26b   : > { %v2246_v23 = vadd.f32 %v1514_v19, %v787_v22  ;;  %v870_v24 = vsel %vm866_vm1, %v2244_v21, -inf }
 0x26c   : > { %871 = vmax.xlane.f32.xlu0 %v870_v24  ;;  %v1721_v25 = vpop.f32.mrf.mxu0 }
 0x26d   : > { %v2250_v26 = vadd.f32 %v1721_v25, %v1514_v19  ;;  %v867_v30 = vsel %vm866_vm1, %v2246_v23, -inf }
 0x26e   : > { %v797_v27 = vpop.f32.mrf.mxu0 }
 0x26f   : > { %v2252_v28 = vadd.f32 %v1514_v19, %v797_v27  ;;  %v876_v29 = vsel %vm866_vm1, %v2250_v26, -inf }
 0x270   : > { %877 = vmax.xlane.f32.xlu1 %v876_v29  ;;  %v1724_v31 = vpop.f32.mrf.mxu0  ;;  %868 = vmax.xlane.f32.xlu0 %v867_v30 }
 0x271   : > { %v2258_v33 = vadd.f32 %v1724_v31, %v1514_v19  ;;  %v873_v35 = vsel %vm866_vm1, %v2252_v28, -inf }
 0x272   : > { %v807_v32 = vpop.f32.mrf.mxu0 }
 0x273   : > { %v2260_v34 = vadd.f32 %v1514_v19, %v807_v32  ;;  %v882_v41 = vsel %vm866_vm1, %v2258_v33, -inf }
 0x274   : > { %v1727_v36 = vpop.f32.mrf.mxu0  ;;  %874 = vmax.xlane.f32.xlu1 %v873_v35 }
 0x275   : > { %v879_v37 = vsel %vm866_vm1, %v2260_v34, -inf  ;;  %v2266_v39 = vadd.f32 %v1727_v36, %v1514_v19 }
 0x276   : > { %v817_v38 = vpop.f32.mrf.mxu0  ;;  %880 = vmax.xlane.f32.xlu0 %v879_v37 }
 0x277   : > { %v2268_v40 = vadd.f32 %v1514_v19, %v817_v38  ;;  %v888_v47 = vsel %vm866_vm1, %v2266_v39, -inf }
 0x278   : > { %v1730_v42 = vpop.f32.mrf.mxu0  ;;  %883 = vmax.xlane.f32.xlu1 %v882_v41 }
 0x279   : > { %v885_v43 = vsel %vm866_vm1, %v2268_v40, -inf  ;;  %v2274_v45 = vadd.f32 %v1730_v42, %v1514_v19 }
 0x27a   : > { %v827_v44 = vpop.f32.mrf.mxu0  ;;  %886 = vmax.xlane.f32.xlu0 %v885_v43 }
 0x27b   : > { %v2276_v46 = vadd.f32 %v1514_v19, %v827_v44  ;;  %v894_v53 = vsel %vm866_vm1, %v2274_v45, -inf }
 0x27c   : > { %v1733_v48 = vpop.f32.mrf.mxu0  ;;  %889 = vmax.xlane.f32.xlu1 %v888_v47 }
 0x27d   : > { %v891_v49 = vsel %vm866_vm1, %v2276_v46, -inf  ;;  %v2282_v51 = vadd.f32 %v1733_v48, %v1514_v19 }
 0x27e   : > { %v837_v50 = vpop.f32.mrf.mxu0  ;;  %892 = vmax.xlane.f32.xlu0 %v891_v49 }
 0x27f   : > { %v2284_v52 = vadd.f32 %v1514_v19, %v837_v50  ;;  %v900_v59 = vsel %vm866_vm1, %v2282_v51, -inf }
 0x280   : > { %v1736_v54 = vpop.f32.mrf.mxu0  ;;  %895 = vmax.xlane.f32.xlu1 %v894_v53 }
 0x281   : > { %v897_v55 = vsel %vm866_vm1, %v2284_v52, -inf  ;;  %v2290_v57 = vadd.f32 %v1736_v54, %v1514_v19 }
 0x282   : > { %v847_v56 = vpop.f32.mrf.mxu0  ;;  %898 = vmax.xlane.f32.xlu0 %v897_v55 }
 0x283   : > { %v2292_v58 = vadd.f32 %v1514_v19, %v847_v56  ;;  %v906_v1 = vsel %vm866_vm1, %v2290_v57, -inf }
 0x284   : > { %v1739_v60 = vpop.f32.mrf.mxu0  ;;  %901 = vmax.xlane.f32.xlu1 %v900_v59 }
 0x285   : > { %v903_v61 = vsel %vm866_vm1, %v2292_v58, -inf  ;;  %v2298_v63 = vadd.f32 %v1739_v60, %v1514_v19 }
 0x286   : > { %v857_v62 = vpop.f32.mrf.mxu0  ;;  %904 = vmax.xlane.f32.xlu0 %v903_v61 }
 0x287   : > { %v2300_v0 = vadd.f32 %v1514_v19, %v857_v62  ;;  %v912_v3 = vsel %vm866_vm1, %v2298_v63, -inf }
 0x288   : > { %907 = vmax.xlane.f32.xlu1 %v906_v1 }
 0x289   : > { %v909_v2 = vsel %vm866_vm1, %v2300_v0, -inf }
 0x28a   : > { %910 = vmax.xlane.f32.xlu0 %v909_v2 }
 0x28c   : > { %913 = vmax.xlane.f32.xlu1 %v912_v3 }
 0x2f5   : > { %v872_v4 = vpop.xlane.xlu0 %871 }
 0x2f6   : > { %v916_v5 = vsub.f32 %v2244_v21, %v872_v4 }
 0x2f8   : > { %v933_v6 = vmul.f32 1.442695, %v916_v5 }
 0x2f9   : > { %v878_v7 = vpop.xlane.xlu1 %877  ;;  %v869_v8 = vpop.xlane.xlu0 %868 }
 0x2fa   : > { %1783 = vpow2.f32 %v933_v6  ;;  %v918_v9 = vsub.f32 %v2250_v26, %v878_v7  ;;  %v915_v10 = vsub.f32 %v2246_v23, %v869_v8 }
 0x2fc   : > { %v937_v11 = vmul.f32 1.442695, %v918_v9  ;;  %v931_v12 = vmul.f32 1.442695, %v915_v10 }
 0x2fd   : > { %v875_v13 = vpop.xlane.xlu1 %874 }
 0x2fe   : > { %1785 = vpow2.f32 %v937_v11  ;;  %v917_v14 = vsub.f32 %v2252_v28, %v875_v13 }
 0x2ff   : > { %1787 = vpow2.f32 %v931_v12  ;;  %v881_v15 = vpop.xlane.xlu0 %880 }
 0x300   : > { %v935_v16 = vmul.f32 1.442695, %v917_v14  ;;  %v919_v17 = vsub.f32 %v2260_v34, %v881_v15 }
 0x301   : > { %v884_v18 = vpop.xlane.xlu1 %883 }
 0x302   : > { %1789 = vpow2.f32 %v935_v16  ;;  %v939_v19 = vmul.f32 1.442695, %v919_v17  ;;  %v920_v20 = vsub.f32 %v2258_v33, %v884_v18 }
 0x303   : > { %v887_v22 = vpop.xlane.xlu0 %886 }
 0x304   : > { %v941_v24 = vmul.f32 1.442695, %v920_v20  ;;  %v921_v25 = vsub.f32 %v2268_v40, %v887_v22  ;;  %1791 = vpow2.f32 %v939_v19 }
 0x305   : > { %v890_v27 = vpop.xlane.xlu1 %889 }
 0x306   : > { %1793 = vpow2.f32 %v941_v24  ;;  %v943_v29 = vmul.f32 1.442695, %v921_v25  ;;  %v922_v30 = vsub.f32 %v2266_v39, %v890_v27 }
 0x307   : > { %v2316_v31 = vpop.eup %1783  ;;  %v893_v32 = vpop.xlane.xlu0 %892 }
 0x308   : > { %v945_v35 = vmul.f32 1.442695, %v922_v30  ;;  %v923_v36 = vsub.f32 %v2276_v46, %v893_v32  ;;  %v966_v37 = vsel %vm866_vm1, %v2316_v31, 0.0  ;;  %1795 = vpow2.f32 %v943_v29 }
 0x309   : > { %967 = vadd.xlane.f32.xlu1 %v966_v37  ;;  %v896_v38 = vpop.xlane.xlu1 %895 }
 0x30a   : > { %1797 = vpow2.f32 %v945_v35  ;;  %v947_v41 = vmul.f32 1.442695, %v923_v36  ;;  %v924_v42 = vsub.f32 %v2274_v45, %v896_v38 }
 0x30b   : > { %v2322_v43 = vpop.eup %1785  ;;  %v899_v44 = vpop.xlane.xlu0 %898 }
 0x30c   : > { %v2324_v47 = vpop.eup %1787  ;;  %v949_v48 = vmul.f32 1.442695, %v924_v42  ;;  %v925_v49 = vsub.f32 %v2284_v52, %v899_v44  ;;  %v972_v50 = vsel %vm866_vm1, %v2322_v43, 0.0  ;;  %1799 = vpow2.f32 %v947_v41 }
 0x30d   : > { %973 = vadd.xlane.f32.xlu1 %v972_v50  ;;  %v902_v53 = vpop.xlane.xlu1 %901  ;;  %v963_v54 = vsel %vm866_vm1, %v2324_v47, 0.0 }
 0x30e   : > { %1801 = vpow2.f32 %v949_v48  ;;  %v951_v55 = vmul.f32 1.442695, %v925_v49  ;;  %v926_v56 = vsub.f32 %v2282_v51, %v902_v53  ;;  %964 = vadd.xlane.f32.xlu0 %v963_v54 }
 0x30f   : > { %v2332_v59 = vpop.eup %1789  ;;  %v905_v60 = vpop.xlane.xlu0 %904 }
 0x310   : > { %v953_v61 = vmul.f32 1.442695, %v926_v56  ;;  %v927_v62 = vsub.f32 %v2292_v58, %v905_v60  ;;  %v969_v1 = vsel %vm866_vm1, %v2332_v59, 0.0  ;;  %1803 = vpow2.f32 %v951_v55 }
 0x311   : > { %v908_v2 = vpop.xlane.xlu1 %907  ;;  %v2337_v3 = vpop.eup %1791 }
 0x312   : > { %1805 = vpow2.f32 %v953_v61  ;;  %v955_v4 = vmul.f32 1.442695, %v927_v62  ;;  %v928_v5 = vsub.f32 %v2290_v57, %v908_v2  ;;  %970 = vadd.xlane.f32.xlu0 %v969_v1  ;;  %v975_v12 = vsel %vm866_vm1, %v2337_v3, 0.0 }
 0x313   : > { %v2340_v6 = vpop.eup %1793  ;;  %v911_v7 = vpop.xlane.xlu0 %910 }
 0x314   : > { %v957_v8 = vmul.f32 1.442695, %v928_v5  ;;  %v929_v9 = vsub.f32 %v2300_v0, %v911_v7  ;;  %v978_v10 = vsel %vm866_vm1, %v2340_v6, 0.0  ;;  %1807 = vpow2.f32 %v955_v4 }
 0x315   : > { %979 = vadd.xlane.f32.xlu1 %v978_v10  ;;  %v914_v11 = vpop.xlane.xlu1 %913  ;;  %v2347_v13 = vpop.eup %1795 }
 0x316   : > { %1809 = vpow2.f32 %v957_v8  ;;  %v959_v14 = vmul.f32 1.442695, %v929_v9  ;;  %v930_v15 = vsub.f32 %v2298_v63, %v914_v11  ;;  %976 = vadd.xlane.f32.xlu0 %v975_v12  ;;  %v981_v19 = vsel %vm866_vm1, %v2347_v13, 0.0 }
 0x317   : > { %v2350_v16 = vpop.eup %1797 }
 0x318   : > { %v961_v17 = vmul.f32 1.442695, %v930_v15  ;;  %v984_v18 = vsel %vm866_vm1, %v2350_v16, 0.0  ;;  %1811 = vpow2.f32 %v959_v14 }
 0x319   : > { %985 = vadd.xlane.f32.xlu1 %v984_v18  ;;  %v2356_v20 = vpop.eup %1799 }
 0x31a   : > { %1813 = vpow2.f32 %v961_v17  ;;  %982 = vadd.xlane.f32.xlu0 %v981_v19  ;;  %v987_v25 = vsel %vm866_vm1, %v2356_v20, 0.0 }
 0x31b   : > { %v2358_v22 = vpop.eup %1801 }
 0x31c   : > { %v990_v24 = vsel %vm866_vm1, %v2358_v22, 0.0 }
 0x31d   : > { %991 = vadd.xlane.f32.xlu1 %v990_v24  ;;  %v2364_v27 = vpop.eup %1803 }
 0x31e   : > { %988 = vadd.xlane.f32.xlu0 %v987_v25  ;;  %v993_v32 = vsel %vm866_vm1, %v2364_v27, 0.0 }
 0x31f   : > { %v2366_v29 = vpop.eup %1805 }
 0x320   : > { %v996_v30 = vsel %vm866_vm1, %v2366_v29, 0.0 }
 0x321   : > { %997 = vadd.xlane.f32.xlu1 %v996_v30  ;;  %v2372_v35 = vpop.eup %1807 }
 0x322   : > { %994 = vadd.xlane.f32.xlu0 %v993_v32  ;;  %v999_v38 = vsel %vm866_vm1, %v2372_v35, 0.0 }
 0x323   : > { %v2374_v36 = vpop.eup %1809 }
 0x324   : > { %v1002_v37 = vsel %vm866_vm1, %v2374_v36, 0.0 }
 0x325   : > { %1003 = vadd.xlane.f32.xlu1 %v1002_v37  ;;  %v2380_v41 = vpop.eup %1811 }
 0x326   : > { %1000 = vadd.xlane.f32.xlu0 %v999_v38  ;;  %v1005_v48 = vsel %vm866_vm1, %v2380_v41, 0.0 }
 0x327   : > { %v2382_v42 = vpop.eup %1813 }
 0x328   : > { %v1008_v44 = vsel %vm866_vm1, %v2382_v42, 0.0 }
 0x329   : > { %1009 = vadd.xlane.f32.xlu1 %v1008_v44 }
 0x32a   : > { %1006 = vadd.xlane.f32.xlu0 %v1005_v48 }
 0x33a   : > { %1350 = vrot.lane.b32.xlu1 %v2244_v21, %s2005_s21 }
 0x33e   : > { %1352 = vrot.lane.b32.xlu1 %v2252_v28, %s2005_s21 }
 0x340   : > { %1348 = vrot.lane.b32.xlu0 %v2246_v23, %s2005_s21 }
 0x342   : > { %1354 = vrot.lane.b32.xlu1 %v2250_v26, %s2005_s21 }
 0x344   : > { %1356 = vrot.lane.b32.xlu0 %v2260_v34, %s2005_s21 }
 0x346   : > { %1358 = vrot.lane.b32.xlu1 %v2258_v33, %s2005_s21 }
 0x392   : > { %v968_v49 = vpop.xlane.xlu1 %967 }
 0x393   : > { %1815 = vrcp.f32 %v968_v49 }
 0x396   : > { %v974_v50 = vpop.xlane.xlu1 %973 }
 0x397   : > { %1817 = vrcp.f32 %v974_v50  ;;  %v965_v21 = vpop.xlane.xlu0 %964 }
 0x398   : > { %1819 = vrcp.f32 %v965_v21 }
 0x39b   : > { %v971_v53 = vpop.xlane.xlu0 %970 }
 0x39c   : > { %1821 = vrcp.f32 %v971_v53 }
 0x39e   : > { %v980_v28 = vpop.xlane.xlu1 %979 }
 0x39f   : > { %1823 = vrcp.f32 %v980_v28  ;;  %v977_v23 = vpop.xlane.xlu0 %976 }
 0x3a0   : > { %v1816_v54 = vpop.eup %1815  ;;  %1825 = vrcp.f32 %v977_v23 }
 0x3a1   : > { %v2401_v26 = vmul.f32 %v1816_v54, %v2316_v31 }
 0x3a2   : > { %v986_v34 = vpop.xlane.xlu1 %985 }
 0x3a3   : > { %1827 = vrcp.f32 %v986_v34  ;;  %v983_v55 = vpop.xlane.xlu0 %982  ;;  %v1045_v33 = vmul.f32 1.442695, %v2401_v26 }
 0x3a4   : > { %v1818_v56 = vpop.eup %1817  ;;  %1829 = vrcp.f32 %v983_v55 }
 0x3a5   : > { %v1820_v60 = vpop.eup %1819  ;;  %v2405_v61 = vmul.f32 %v1818_v56, %v2322_v43  ;;  %1831 = vpow2.f32 %v1045_v33 }
 0x3a6   : > { %v2408_v62 = vmul.f32 %v1820_v60, %v2324_v47  ;;  %v992_v1 = vpop.xlane.xlu1 %991 }
 0x3a7   : > { %1833 = vrcp.f32 %v992_v1  ;;  %v989_v2 = vpop.xlane.xlu0 %988  ;;  %v1049_v31 = vmul.f32 1.442695, %v2405_v61 }
 0x3a8   : > { %1835 = vrcp.f32 %v989_v2  ;;  %v1043_v4 = vmul.f32 1.442695, %v2408_v62 }
 0x3a9   : > { %v1822_v5 = vpop.eup %1821  ;;  %1837 = vpow2.f32 %v1049_v31 }
 0x3aa   : > { %v2413_v7 = vmul.f32 %v1822_v5, %v2332_v59  ;;  %v998_v8 = vpop.xlane.xlu1 %997  ;;  %1839 = vpow2.f32 %v1043_v4 }
 0x3ab   : > { %1841 = vrcp.f32 %v998_v8  ;;  %v995_v43 = vpop.xlane.xlu0 %994 }
 0x3ac   : > { %v1824_v9 = vpop.eup %1823  ;;  %1843 = vrcp.f32 %v995_v43  ;;  %v1047_v47 = vmul.f32 1.442695, %v2413_v7 }
 0x3ad   : > { %v1826_v10 = vpop.eup %1825  ;;  %v2417_v11 = vmul.f32 %v1824_v9, %v2340_v6 }
 0x3ae   : > { %v2420_v12 = vmul.f32 %v1826_v10, %v2337_v3  ;;  %v1004_v14 = vpop.xlane.xlu1 %1003  ;;  %1845 = vpow2.f32 %v1047_v47 }
 0x3af   : > { %1847 = vrcp.f32 %v1004_v14  ;;  %v1001_v59 = vpop.xlane.xlu0 %1000  ;;  %v1053_v15 = vmul.f32 1.442695, %v2417_v11 }
 0x3b0   : > { %v1828_v17 = vpop.eup %1827  ;;  %1849 = vrcp.f32 %v1001_v59  ;;  %v1051_v18 = vmul.f32 1.442695, %v2420_v12 }
 0x3b1   : > { %v1830_v19 = vpop.eup %1829  ;;  %v2425_v24 = vmul.f32 %v1828_v17, %v2350_v16  ;;  %1851 = vpow2.f32 %v1053_v15 }
 0x3b2   : > { %v1832_v6 = vpop.eup %1831  ;;  %v2428_v25 = vmul.f32 %v1830_v19, %v2347_v13  ;;  %v1010_v3 = vpop.xlane.xlu1 %1009  ;;  %1853 = vpow2.f32 %v1051_v18 }
 0x3b3   : > { %1855 = vrcp.f32 %v1010_v3  ;;  %v1007_v30 = vpop.xlane.xlu0 %1006  ;;  %v1078_v32 = vsel %vm866_vm1, %v1832_v6, 0.0  ;;  %v1057_v37 = vmul.f32 1.442695, %v2425_v24 }
 0x3b4   : > { %v1834_v38 = vpop.eup %1833  ;;  %1857 = vrcp.f32 %v1007_v30  ;;  %1079 = vadd.xlane.f32.xlu1 %v1078_v32  ;;  %v1055_v44 = vmul.f32 1.442695, %v2428_v25 }
 0x3b5   : > { %v1836_v16 = vpop.eup %1835  ;;  %v2434_v48 = vmul.f32 %v1834_v38, %v2358_v22  ;;  %1859 = vpow2.f32 %v1057_v37 }
 0x3b6   : > { %v1838_v13 = vpop.eup %1837  ;;  %v2437_v49 = vmul.f32 %v1836_v16, %v2356_v20  ;;  %1861 = vpow2.f32 %v1055_v44 }
 0x3b7   : > { %v1840_v50 = vpop.eup %1839  ;;  %v1084_v21 = vsel %vm866_vm1, %v1838_v13, 0.0  ;;  %v1061_v53 = vmul.f32 1.442695, %v2434_v48 }
 0x3b8   : > { %v1842_v28 = vpop.eup %1841  ;;  %1085 = vadd.xlane.f32.xlu1 %v1084_v21  ;;  %v1075_v23 = vsel %vm866_vm1, %v1840_v50, 0.0  ;;  %v1059_v54 = vmul.f32 1.442695, %v2437_v49 }
 0x3b9   : > { %v1844_v34 = vpop.eup %1843  ;;  %v2444_v22 = vmul.f32 %v1842_v28, %v2366_v29  ;;  %1076 = vadd.xlane.f32.xlu0 %v1075_v23  ;;  %1863 = vpow2.f32 %v1061_v53  ;;  %v2006_v53 = vmov 0.0  }
 0x3ba   : > { %v2447_v20 = vmul.f32 %v1844_v34, %v2364_v27  ;;  %1865 = vpow2.f32 %v1059_v54  ;;  %1284 = vst [vmem:[%s2481_s23 + $0x8] sm:$0xff] %v2006_v53  ;;  %1283 = vst [vmem:[%s2481_s23] sm:$0xff] %v2006_v53  ;;  %v2523_v34 = vpop.permute.xlu0 %1348 }
 0x3bb   : > { %v1846_v55 = vpop.eup %1845  ;;  %v1065_v33 = vmul.f32 1.442695, %v2444_v22  ;;  %1285 = vst [vmem:[%s2481_s23 + $0x10] sm:$0xff] %v2006_v53  ;;  %1286 = vst [vmem:[%s2481_s23 + $0x18] sm:$0xff] %v2006_v53 }
 0x3bc   : > { %v1848_v56 = vpop.eup %1847  ;;  %v1081_v60 = vsel %vm866_vm1, %v1846_v55, 0.0  ;;  %v1063_v1 = vmul.f32 1.442695, %v2447_v20  ;;  %1287 = vst [vmem:[%s2481_s23 + $0x20] sm:$0xff] %v2006_v53  ;;  %1288 = vst [vmem:[%s2481_s23 + $0x28] sm:$0xff] %v2006_v53 }
 0x3bd   : > { %v1850_v2 = vpop.eup %1849  ;;  %v2453_v31 = vmul.f32 %v1848_v56, %v2374_v36  ;;  %1082 = vadd.xlane.f32.xlu0 %v1081_v60  ;;  %1867 = vpow2.f32 %v1065_v33  ;;  %1289 = vst [vmem:[%s2481_s23 + $0x30] sm:$0xff] %v2006_v53  ;;  %1290 = vst [vmem:[%s2481_s23 + $0x38] sm:$0xff] %v2006_v53 }
 0x3be   : > { %v1852_v29 = vpop.eup %1851  ;;  %v2456_v4 = vmul.f32 %v1850_v2, %v2372_v35  ;;  %1869 = vpow2.f32 %v1063_v1  ;;  %1291 = vst [vmem:[%s2481_s23 + $0x40] sm:$0xff] %v2006_v53  ;;  %1292 = vst [vmem:[%s2481_s23 + $0x48] sm:$0xff] %v2006_v53  ;;  %v2527_v55 = vpop.permute.xlu0 %1356 }
 0x3bf   : > { %v1854_v27 = vpop.eup %1853  ;;  %v1090_v5 = vsel %vm866_vm1, %v1852_v29, 0.0  ;;  %v1069_v8 = vmul.f32 1.442695, %v2453_v31  ;;  %1293 = vst [vmem:[%s2481_s23 + $0x50] sm:$0xff] %v2006_v53  ;;  %1294 = vst [vmem:[%s2481_s23 + $0x58] sm:$0xff] %v2006_v53 }
 0x3c0   : > { %v1856_v43 = vpop.eup %1855  ;;  %1091 = vadd.xlane.f32.xlu1 %v1090_v5  ;;  %v1087_v9 = vsel %vm866_vm1, %v1854_v27, 0.0  ;;  %v1067_v47 = vmul.f32 1.442695, %v2456_v4  ;;  %1295 = vst [vmem:[%s2481_s23 + $0x60] sm:$0xff] %v2006_v53  ;;  %1296 = vst [vmem:[%s2481_s23 + $0x68] sm:$0xff] %v2006_v53 }
 0x3c1   : > { %v1858_v36 = vpop.eup %1857  ;;  %v2463_v10 = vmul.f32 %v1856_v43, %v2382_v42  ;;  %1088 = vadd.xlane.f32.xlu0 %v1087_v9  ;;  %1871 = vpow2.f32 %v1069_v8  ;;  %1297 = vst [vmem:[%s2481_s23 + $0x70] sm:$0xff] %v2006_v53  ;;  %1298 = vst [vmem:[%s2481_s23 + $0x78] sm:$0xff] %v2006_v53 }
 0x3c2   : > { %v1860_v35 = vpop.eup %1859  ;;  %v2466_v14 = vmul.f32 %v1858_v36, %v2380_v41  ;;  %1873 = vpow2.f32 %v1067_v47 }
 0x3c3   : > { %v1862_v59 = vpop.eup %1861  ;;  %v1096_v15 = vsel %vm866_vm1, %v1860_v35, 0.0  ;;  %v1073_v17 = vmul.f32 1.442695, %v2463_v10 }
 0x3c4   : > { %1097 = vadd.xlane.f32.xlu1 %v1096_v15  ;;  %v1093_v18 = vsel %vm866_vm1, %v1862_v59, 0.0  ;;  %v1071_v19 = vmul.f32 1.442695, %v2466_v14 }
 0x3c5   : > { %1094 = vadd.xlane.f32.xlu0 %v1093_v18  ;;  %1875 = vpow2.f32 %v1073_v17 }
 0x3c6   : > { %v1864_v42 = vpop.eup %1863  ;;  %1877 = vpow2.f32 %v1071_v19 }
 0x3c7   : > { %v1866_v6 = vpop.eup %1865  ;;  %v1102_v41 = vsel %vm866_vm1, %v1864_v42, 0.0 }
 0x3c8   : > { %1103 = vadd.xlane.f32.xlu1 %v1102_v41  ;;  %v1099_v3 = vsel %vm866_vm1, %v1866_v6, 0.0 }
 0x3c9   : > { %1100 = vadd.xlane.f32.xlu0 %v1099_v3 }
 0x3ca   : > { %v1868_v30 = vpop.eup %1867 }
 0x3cb   : > { %v1870_v32 = vpop.eup %1869  ;;  %v1108_v37 = vsel %vm866_vm1, %v1868_v30, 0.0 }
 0x3cc   : > { %1109 = vadd.xlane.f32.xlu1 %v1108_v37  ;;  %v1105_v38 = vsel %vm866_vm1, %v1870_v32, 0.0 }
 0x3cd   : > { %1106 = vadd.xlane.f32.xlu0 %v1105_v38 }
 0x3ce   : > { %v1872_v44 = vpop.eup %1871 }
 0x3cf   : > { %v1874_v16 = vpop.eup %1873  ;;  %v1114_v13 = vsel %vm866_vm1, %v1872_v44, 0.0 }
 0x3d0   : > { %1115 = vadd.xlane.f32.xlu1 %v1114_v13  ;;  %v1111_v50 = vsel %vm866_vm1, %v1874_v16, 0.0 }
 0x3d1   : > { %1112 = vadd.xlane.f32.xlu0 %v1111_v50 }
 0x3d2   : > { %v1876_v21 = vpop.eup %1875 }
 0x3d3   : > { %v1878_v28 = vpop.eup %1877  ;;  %v1120_v23 = vsel %vm866_vm1, %v1876_v21, 0.0 }
 0x3d4   : > { %1121 = vadd.xlane.f32.xlu1 %v1120_v23  ;;  %v1117_v54 = vsel %vm866_vm1, %v1878_v28, 0.0 }
 0x3d5   : > { %1118 = vadd.xlane.f32.xlu0 %v1117_v54 }
 0x3e5   : > { %1362 = vrot.lane.b32.xlu1 %v2266_v39, %s2005_s21  ;;  %v2517_v39 = vpop.permute.xlu1 %1350 }
 0x3e9   : > { %1366 = vrot.lane.b32.xlu1 %v2274_v45, %s2005_s21  ;;  %v2519_v45 = vpop.permute.xlu1 %1352 }
 0x3eb   : > { %1360 = vrot.lane.b32.xlu0 %v2268_v40, %s2005_s21 }
 0x3ed   : > { %1370 = vrot.lane.b32.xlu1 %v2282_v51, %s2005_s21  ;;  %v2521_v40 = vpop.permute.xlu1 %1354 }
 0x3ef   : > { %1364 = vrot.lane.b32.xlu0 %v2276_v46, %s2005_s21 }
 0x3f1   : > { %1374 = vrot.lane.b32.xlu1 %v2290_v57, %s2005_s21  ;;  %v2525_v51 = vpop.permute.xlu1 %1358 }
 0x3f3   : > { %1368 = vrot.lane.b32.xlu0 %v2284_v52, %s2005_s21 }
 0x3f7   : > { %1372 = vrot.lane.b32.xlu0 %v2292_v58, %s2005_s21 }
 0x43d   : > { %v1080_v46 = vpop.xlane.xlu1 %1079 }
 0x43e   : > { %1879 = vlog2.f32 %v1080_v46 }
 0x441   : > { %v1086_v57 = vpop.xlane.xlu1 %1085 }
 0x442   : > { %1881 = vlog2.f32 %v1086_v57  ;;  %v1077_v52 = vpop.xlane.xlu0 %1076 }
 0x443   : > { %1883 = vlog2.f32 %v1077_v52 }
 0x446   : > { %v1083_v33 = vpop.xlane.xlu0 %1082 }
 0x447   : > { %1885 = vlog2.f32 %v1083_v33 }
 0x449   : > { %v1092_v58 = vpop.xlane.xlu1 %1091 }
 0x44a   : > { %1887 = vlog2.f32 %v1092_v58  ;;  %v1089_v56 = vpop.xlane.xlu0 %1088 }
 0x44b   : > { %v1880_v60 = vpop.eup %1879  ;;  %1889 = vlog2.f32 %v1089_v56 }
 0x44c   : > { %v1126_v1 = vmul.f32 0.6931472, %v1880_v60 }
 0x44d   : > { %v1098_v2 = vpop.xlane.xlu1 %1097 }
 0x44e   : > { %v1156_v29 = vsub.f32 %v2401_v26, %v1126_v1  ;;  %1891 = vlog2.f32 %v1098_v2  ;;  %v1095_v27 = vpop.xlane.xlu0 %1094 }
 0x44f   : > { %v1882_v5 = vpop.eup %1881  ;;  %1893 = vlog2.f32 %v1095_v27 }
 0x450   : > { %v1884_v8 = vpop.eup %1883  ;;  %v1173_v43 = vmul.f32 1.442695, %v1156_v29  ;;  %v1130_v9 = vmul.f32 0.6931472, %v1882_v5  ;;  %1300 = vst.msk [vmem:[%s2481_s23 + $0x8] sm:$0xff] %vm866_vm1, %v1156_v29 }
 0x451   : > { %v1124_v47 = vmul.f32 0.6931472, %v1884_v8  ;;  %v1104_v36 = vpop.xlane.xlu1 %1103 }
 0x452   : > { %1895 = vpow2.f32 %v1173_v43  ;;  %v2533_v35 = vsub.f32 %v2405_v61, %v1130_v9  ;;  %v1101_v59 = vpop.xlane.xlu0 %1100 }
 0x453   : > { %v2536_v26 = vsub.f32 %v2408_v62, %v1124_v47  ;;  %1897 = vlog2.f32 %v1104_v36 }
 0x454   : > { %v1886_v15 = vpop.eup %1885  ;;  %v1177_v17 = vmul.f32 1.442695, %v2533_v35  ;;  %1899 = vlog2.f32 %v1101_v59  ;;  %1302 = vst.msk [vmem:[%s2481_s23 + $0x18] sm:$0xff] %vm866_vm1, %v2533_v35 }
 0x455   : > { %v1171_v18 = vmul.f32 1.442695, %v2536_v26  ;;  %v1128_v19 = vmul.f32 0.6931472, %v1886_v15  ;;  %v1110_v42 = vpop.xlane.xlu1 %1109  ;;  %1299 = vst.msk [vmem:[%s2481_s23] sm:$0xff] %vm866_vm1, %v2536_v26 }
 0x456   : > { %1901 = vpow2.f32 %v1177_v17  ;;  %v1107_v61 = vpop.xlane.xlu0 %1106 }
 0x457   : > { %v1888_v62 = vpop.eup %1887  ;;  %1903 = vpow2.f32 %v1171_v18  ;;  %v2547_v6 = vsub.f32 %v2413_v7, %v1128_v19 }
 0x458   : > { %v1890_v41 = vpop.eup %1889  ;;  %v1134_v3 = vmul.f32 0.6931472, %v1888_v62  ;;  %1905 = vlog2.f32 %v1110_v42 }
 0x459   : > { %v1175_v30 = vmul.f32 1.442695, %v2547_v6  ;;  %v1132_v32 = vmul.f32 0.6931472, %v1890_v41  ;;  %1907 = vlog2.f32 %v1107_v61  ;;  %v1116_v37 = vpop.xlane.xlu1 %1115  ;;  %1301 = vst.msk [vmem:[%s2481_s23 + $0x10] sm:$0xff] %vm866_vm1, %v2547_v6 }
 0x45a   : > { %v2554_v38 = vsub.f32 %v2417_v11, %v1134_v3  ;;  %1909 = vlog2.f32 %v1116_v37  ;;  %v1113_v44 = vpop.xlane.xlu0 %1112 }
 0x45b   : > { %v1892_v7 = vpop.eup %1891  ;;  %1911 = vpow2.f32 %v1175_v30  ;;  %v2557_v16 = vsub.f32 %v2420_v12, %v1132_v32 }
 0x45c   : > { %v1894_v13 = vpop.eup %1893  ;;  %v1181_v50 = vmul.f32 1.442695, %v2554_v38  ;;  %v1138_v21 = vmul.f32 0.6931472, %v1892_v7  ;;  %1913 = vlog2.f32 %v1113_v44  ;;  %1304 = vst.msk [vmem:[%s2481_s23 + $0x28] sm:$0xff] %vm866_vm1, %v2554_v38 }
 0x45d   : > { %v1179_v53 = vmul.f32 1.442695, %v2557_v16  ;;  %v1136_v11 = vmul.f32 0.6931472, %v1894_v13  ;;  %v1122_v28 = vpop.xlane.xlu1 %1121  ;;  %1303 = vst.msk [vmem:[%s2481_s23 + $0x20] sm:$0xff] %vm866_vm1, %v2557_v16 }
 0x45e   : > { %1915 = vpow2.f32 %v1181_v50  ;;  %v2568_v12 = vsub.f32 %v2425_v24, %v1138_v21  ;;  %v1119_v23 = vpop.xlane.xlu0 %1118 }
 0x45f   : > { %v1896_v54 = vpop.eup %1895  ;;  %1917 = vpow2.f32 %v1179_v53  ;;  %v2571_v46 = vsub.f32 %v2428_v25, %v1136_v11 }
 0x460   : > { %v1898_v57 = vpop.eup %1897  ;;  %v1185_v52 = vmul.f32 1.442695, %v2568_v12  ;;  %1919 = vlog2.f32 %v1122_v28  ;;  %v1204_v33 = vmul.f32 %v1896_v54, %v1156_v29  ;;  %1306 = vst.msk [vmem:[%s2481_s23 + $0x38] sm:$0xff] %vm866_vm1, %v2568_v12 }
 0x461   : > { %v1900_v58 = vpop.eup %1899  ;;  %v1183_v56 = vmul.f32 1.442695, %v2571_v46  ;;  %v1142_v60 = vmul.f32 0.6931472, %v1898_v57  ;;  %1921 = vlog2.f32 %v1119_v23  ;;  %1305 = vst.msk [vmem:[%s2481_s23 + $0x30] sm:$0xff] %vm866_vm1, %v2571_v46 }
 0x462   : > { %1923 = vpow2.f32 %v1185_v52  ;;  %v1140_v24 = vmul.f32 0.6931472, %v1900_v58  ;;  %v1222_v25 = vsel %vm866_vm1, %v1204_v33, 0.0 }
 0x463   : > { %v1902_v1 = vpop.eup %1901  ;;  %1925 = vpow2.f32 %v1183_v56  ;;  %v2583_v2 = vsub.f32 %v2434_v48, %v1142_v60  ;;  %1223 = vadd.xlane.f32.xlu1 %v1222_v25 }
 0x464   : > { %v1904_v29 = vpop.eup %1903  ;;  %v2586_v27 = vsub.f32 %v2437_v49, %v1140_v24  ;;  %v1206_v5 = vmul.f32 %v1902_v1, %v2533_v35 }
 0x465   : > { %v1906_v8 = vpop.eup %1905  ;;  %v1189_v43 = vmul.f32 1.442695, %v2583_v2  ;;  %v1203_v9 = vmul.f32 %v1904_v29, %v2536_v26  ;;  %1308 = vst.msk [vmem:[%s2481_s23 + $0x48] sm:$0xff] %vm866_vm1, %v2583_v2 }
 0x466   : > { %v1908_v47 = vpop.eup %1907  ;;  %v1187_v36 = vmul.f32 1.442695, %v2586_v27  ;;  %v1146_v48 = vmul.f32 0.6931472, %v1906_v8  ;;  %v1228_v59 = vsel %vm866_vm1, %v1206_v5, 0.0  ;;  %1307 = vst.msk [vmem:[%s2481_s23 + $0x40] sm:$0xff] %vm866_vm1, %v2586_v27 }
 0x467   : > { %v1910_v49 = vpop.eup %1909  ;;  %1927 = vpow2.f32 %v1189_v43  ;;  %v1144_v35 = vmul.f32 0.6931472, %v1908_v47  ;;  %1229 = vadd.xlane.f32.xlu1 %v1228_v59  ;;  %v1219_v15 = vsel %vm866_vm1, %v1203_v9, 0.0 }
 0x468   : > { %v1912_v26 = vpop.eup %1911  ;;  %1929 = vpow2.f32 %v1187_v36  ;;  %v1166_v17 = vsub.f32 %v2444_v22, %v1146_v48  ;;  %v1150_v18 = vmul.f32 0.6931472, %v1910_v49  ;;  %1220 = vadd.xlane.f32.xlu0 %v1219_v15 }
 0x469   : > { %v1914_v19 = vpop.eup %1913  ;;  %v1165_v42 = vsub.f32 %v2447_v20, %v1144_v35  ;;  %v1205_v61 = vmul.f32 %v1912_v26, %v2547_v6 }
 0x46a   : > { %v1193_v62 = vmul.f32 1.442695, %v1166_v17  ;;  %v1168_v41 = vsub.f32 %v2453_v31, %v1150_v18  ;;  %v1148_v3 = vmul.f32 0.6931472, %v1914_v19  ;;  %1310 = vst.msk [vmem:[%s2481_s23 + $0x58] sm:$0xff] %vm866_vm1, %v1166_v17  ;;  %v1363_v18 = vpop.permute.xlu1 %1362  ;;  %v1361_v19 = vpop.permute.xlu0 %1360 }
 0x46b   : > { %v1916_v30 = vpop.eup %1915  ;;  %v1191_v32 = vmul.f32 1.442695, %v1165_v42  ;;  %v1225_v37 = vsel %vm866_vm1, %v1205_v61, 0.0  ;;  %1309 = vst.msk [vmem:[%s2481_s23 + $0x50] sm:$0xff] %vm866_vm1, %v1165_v42 }
 0x46c   : > { %v1918_v22 = vpop.eup %1917  ;;  %1931 = vpow2.f32 %v1193_v62  ;;  %v1197_v44 = vmul.f32 1.442695, %v1168_v41  ;;  %v1167_v20 = vsub.f32 %v2456_v4, %v1148_v3  ;;  %1226 = vadd.xlane.f32.xlu0 %v1225_v37  ;;  %v1208_v6 = vmul.f32 %v1916_v30, %v2554_v38  ;;  %1312 = vst.msk [vmem:[%s2481_s23 + $0x68] sm:$0xff] %vm866_vm1, %v1168_v41 }
 0x46d   : > { %v1920_v31 = vpop.eup %1919  ;;  %1933 = vpow2.f32 %v1191_v32  ;;  %v1207_v7 = vmul.f32 %v1918_v22, %v2557_v16 }
 0x46e   : > { %v1922_v13 = vpop.eup %1921  ;;  %1935 = vpow2.f32 %v1197_v44  ;;  %v1195_v50 = vmul.f32 1.442695, %v1167_v20  ;;  %v1154_v21 = vmul.f32 0.6931472, %v1920_v31  ;;  %v1234_v53 = vsel %vm866_vm1, %v1208_v6, 0.0  ;;  %1311 = vst.msk [vmem:[%s2481_s23 + $0x60] sm:$0xff] %vm866_vm1, %v1167_v20  ;;  %v1365_v61 = vpop.permute.xlu0 %1364 }
 0x46f   : > { %v1924_v11 = vpop.eup %1923  ;;  %v1152_v4 = vmul.f32 0.6931472, %v1922_v13  ;;  %1235 = vadd.xlane.f32.xlu1 %v1234_v53  ;;  %v1231_v38 = vsel %vm866_vm1, %v1207_v7, 0.0 }
 0x470   : > { %v1926_v28 = vpop.eup %1925  ;;  %1937 = vpow2.f32 %v1195_v50  ;;  %v1170_v23 = vsub.f32 %v2463_v10, %v1154_v21  ;;  %1232 = vadd.xlane.f32.xlu0 %v1231_v38  ;;  %v1210_v16 = vmul.f32 %v1924_v11, %v2568_v12 }
 0x471   : > { %v1169_v54 = vsub.f32 %v2466_v14, %v1152_v4  ;;  %v1209_v57 = vmul.f32 %v1926_v28, %v2571_v46 }
 0x472   : > { %v1201_v52 = vmul.f32 1.442695, %v1170_v23  ;;  %v1240_v33 = vsel %vm866_vm1, %v1210_v16, 0.0  ;;  %1314 = vst.msk [vmem:[%s2481_s23 + $0x78] sm:$0xff] %vm866_vm1, %v1170_v23 }
 0x473   : > { %v1199_v58 = vmul.f32 1.442695, %v1169_v54  ;;  %1241 = vadd.xlane.f32.xlu1 %v1240_v33  ;;  %v1237_v56 = vsel %vm866_vm1, %v1209_v57, 0.0  ;;  %1313 = vst.msk [vmem:[%s2481_s23 + $0x70] sm:$0xff] %vm866_vm1, %v1169_v54 }
 0x474   : > { %v1928_v60 = vpop.eup %1927  ;;  %1939 = vpow2.f32 %v1201_v52  ;;  %1238 = vadd.xlane.f32.xlu0 %v1237_v56 }
 0x475   : > { %v1930_v10 = vpop.eup %1929  ;;  %1941 = vpow2.f32 %v1199_v58  ;;  %v1212_v14 = vmul.f32 %v1928_v60, %v2583_v2 }
 0x476   : > { %v1211_v12 = vmul.f32 %v1930_v10, %v2586_v27 }
 0x477   : > { %v1246_v46 = vsel %vm866_vm1, %v1212_v14, 0.0 }
 0x478   : > { %1247 = vadd.xlane.f32.xlu1 %v1246_v46  ;;  %v1243_v24 = vsel %vm866_vm1, %v1211_v12, 0.0 }
 0x479   : > { %v1932_v25 = vpop.eup %1931  ;;  %1244 = vadd.xlane.f32.xlu0 %v1243_v24 }
 0x47a   : > { %v1934_v1 = vpop.eup %1933  ;;  %v1214_v29 = vmul.f32 %v1932_v25, %v1166_v17 }
 0x47b   : > { %v1936_v5 = vpop.eup %1935  ;;  %v1213_v8 = vmul.f32 %v1934_v1, %v1165_v42  ;;  %v1367_v42 = vpop.permute.xlu1 %1366 }
 0x47c   : > { %v1252_v43 = vsel %vm866_vm1, %v1214_v29, 0.0  ;;  %v1216_v9 = vmul.f32 %v1936_v5, %v1168_v41  ;;  %v1369_v41 = vpop.permute.xlu0 %1368 }
 0x47d   : > { %v1938_v47 = vpop.eup %1937  ;;  %1253 = vadd.xlane.f32.xlu1 %v1252_v43  ;;  %v1249_v2 = vsel %vm866_vm1, %v1213_v8, 0.0 }
 0x47e   : > { %1250 = vadd.xlane.f32.xlu0 %v1249_v2  ;;  %v1258_v27 = vsel %vm866_vm1, %v1216_v9, 0.0  ;;  %v1215_v36 = vmul.f32 %v1938_v47, %v1167_v20 }
 0x47f   : > { %v1371_v62 = vpop.permute.xlu1 %1370 }
 0x480   : > { %v1255_v48 = vsel %vm866_vm1, %v1215_v36, 0.0  ;;  %v1373_v32 = vpop.permute.xlu0 %1372 }
 0x481   : > { %v1940_v59 = vpop.eup %1939  ;;  %1259 = vadd.xlane.f32.xlu1 %v1258_v27 }
 0x482   : > { %v1942_v49 = vpop.eup %1941  ;;  %1256 = vadd.xlane.f32.xlu0 %v1255_v48  ;;  %v1218_v35 = vmul.f32 %v1940_v59, %v1170_v23 }
 0x483   : > { %v1217_v15 = vmul.f32 %v1942_v49, %v1169_v54  ;;  %v1375_v3 = vpop.permute.xlu1 %1374 }
 0x484   : > { %v1264_v26 = vsel %vm866_vm1, %v1218_v35, 0.0 }
 0x485   : > { %1265 = vadd.xlane.f32.xlu1 %v1264_v26  ;;  %v1261_v17 = vsel %vm866_vm1, %v1217_v15, 0.0 }
 0x486   : > { %1262 = vadd.xlane.f32.xlu0 %v1261_v17 }
 0x496   : > { %1378 = vrot.lane.b32.xlu1 %v2298_v63, %s2005_s21 }
 0x49c   : > { %1376 = vrot.lane.b32.xlu0 %v2300_v0, %s2005_s21 }
 0x4ec   : > { %v1224_v30 = vpop.xlane.xlu1 %1223 }
 0x4ed   : > { %v1268_v63 = vsub.f32 0.0, %v1224_v30 }
 0x4ef   : > { %1317 = vst.msk [vmem:[%s2481_s23 + $0x8] sm:$0xff] %vm1315_vm2, %v1268_v63 }
 0x4f0   : > { %1398 = vst.msk [vmem:[%s2481_s23 + $0x8] sm:$0xff] %vm1396_vm3, %v2517_v39  ;;  %v1230_v0 = vpop.xlane.xlu1 %1229 }
 0x4f1   : > { %v1270_v37 = vsub.f32 0.0, %v1230_v0  ;;  %v1221_v22 = vpop.xlane.xlu0 %1220 }
 0x4f2   : > { %v1267_v44 = vsub.f32 0.0, %v1221_v22 }
 0x4f3   : > { %1319 = vst.msk [vmem:[%s2481_s23 + $0x18] sm:$0xff] %vm1315_vm2, %v1270_v37 }
 0x4f4   : > { %1400 = vst.msk [vmem:[%s2481_s23 + $0x18] sm:$0xff] %vm1396_vm3, %v2521_v40 }
 0x4f5   : > { %1316 = vst.msk [vmem:[%s2481_s23] sm:$0xff] %vm1315_vm2, %v1267_v44  ;;  %v1227_v20 = vpop.xlane.xlu0 %1226 }
 0x4f6   : > { %1397 = vst.msk [vmem:[%s2481_s23] sm:$0xff] %vm1396_vm3, %v2523_v34  ;;  %v1269_v39 = vsub.f32 0.0, %v1227_v20 }
 0x4f8   : > { %1318 = vst.msk [vmem:[%s2481_s23 + $0x10] sm:$0xff] %vm1315_vm2, %v1269_v39  ;;  %v1236_v6 = vpop.xlane.xlu1 %1235 }
 0x4f9   : > { %1399 = vst.msk [vmem:[%s2481_s23 + $0x10] sm:$0xff] %vm1396_vm3, %v2519_v45  ;;  %v1272_v31 = vsub.f32 0.0, %v1236_v6  ;;  %v1233_v7 = vpop.xlane.xlu0 %1232 }
 0x4fa   : > { %v1271_v40 = vsub.f32 0.0, %v1233_v7 }
 0x4fb   : > { %1321 = vst.msk [vmem:[%s2481_s23 + $0x28] sm:$0xff] %vm1315_vm2, %v1272_v31 }
 0x4fc   : > { %1402 = vst.msk [vmem:[%s2481_s23 + $0x28] sm:$0xff] %vm1396_vm3, %v2525_v51  ;;  %v1242_v34 = vpop.xlane.xlu1 %1241 }
 0x4fd   : > { %1320 = vst.msk [vmem:[%s2481_s23 + $0x20] sm:$0xff] %vm1315_vm2, %v1271_v40  ;;  %v1274_v13 = vsub.f32 0.0, %v1242_v34  ;;  %v1239_v45 = vpop.xlane.xlu0 %1238 }
 0x4fe   : > { %1401 = vst.msk [vmem:[%s2481_s23 + $0x20] sm:$0xff] %vm1396_vm3, %v2527_v55  ;;  %v1273_v50 = vsub.f32 0.0, %v1239_v45 }
 0x4ff   : > { %1323 = vst.msk [vmem:[%s2481_s23 + $0x38] sm:$0xff] %vm1315_vm2, %v1274_v13 }
 0x500   : > { %1404 = vst.msk [vmem:[%s2481_s23 + $0x38] sm:$0xff] %vm1396_vm3, %v1363_v18 }
 0x501   : > { %1322 = vst.msk [vmem:[%s2481_s23 + $0x30] sm:$0xff] %vm1315_vm2, %v1273_v50  ;;  %v1248_v51 = vpop.xlane.xlu1 %1247 }
 0x502   : > { %1403 = vst.msk [vmem:[%s2481_s23 + $0x30] sm:$0xff] %vm1396_vm3, %v1361_v19  ;;  %v1276_v21 = vsub.f32 0.0, %v1248_v51  ;;  %v1245_v53 = vpop.xlane.xlu0 %1244 }
 0x503   : > { %v1275_v11 = vsub.f32 0.0, %v1245_v53 }
 0x504   : > { %1325 = vst.msk [vmem:[%s2481_s23 + $0x48] sm:$0xff] %vm1315_vm2, %v1276_v21 }
 0x505   : > { %1406 = vst.msk [vmem:[%s2481_s23 + $0x48] sm:$0xff] %vm1396_vm3, %v1367_v42 }
 0x506   : > { %1324 = vst.msk [vmem:[%s2481_s23 + $0x40] sm:$0xff] %vm1315_vm2, %v1275_v11  ;;  %v1254_v55 = vpop.xlane.xlu1 %1253 }
 0x507   : > { %1405 = vst.msk [vmem:[%s2481_s23 + $0x40] sm:$0xff] %vm1396_vm3, %v1365_v61  ;;  %v1278_v4 = vsub.f32 0.0, %v1254_v55  ;;  %v1251_v38 = vpop.xlane.xlu0 %1250 }
 0x508   : > { %v1277_v28 = vsub.f32 0.0, %v1251_v38 }
 0x509   : > { %1327 = vst.msk [vmem:[%s2481_s23 + $0x58] sm:$0xff] %vm1315_vm2, %v1278_v4 }
 0x50a   : > { %1408 = vst.msk [vmem:[%s2481_s23 + $0x58] sm:$0xff] %vm1396_vm3, %v1371_v62  ;;  %v1260_v23 = vpop.xlane.xlu1 %1259 }
 0x50b   : > { %1326 = vst.msk [vmem:[%s2481_s23 + $0x50] sm:$0xff] %vm1315_vm2, %v1277_v28  ;;  %v1280_v16 = vsub.f32 0.0, %v1260_v23  ;;  %v1257_v54 = vpop.xlane.xlu0 %1256 }
 0x50c   : > { %1407 = vst.msk [vmem:[%s2481_s23 + $0x50] sm:$0xff] %vm1396_vm3, %v1369_v41  ;;  %v1279_v57 = vsub.f32 0.0, %v1257_v54 }
 0x50d   : > { %1329 = vst.msk [vmem:[%s2481_s23 + $0x68] sm:$0xff] %vm1315_vm2, %v1280_v16 }
 0x50e   : > { %1410 = vst.msk [vmem:[%s2481_s23 + $0x68] sm:$0xff] %vm1396_vm3, %v1375_v3  ;;  %v1266_v52 = vpop.xlane.xlu1 %1265 }
 0x50f   : > { %1328 = vst.msk [vmem:[%s2481_s23 + $0x60] sm:$0xff] %vm1315_vm2, %v1279_v57  ;;  %v1282_v33 = vsub.f32 0.0, %v1266_v52  ;;  %v1263_v58 = vpop.xlane.xlu0 %1262 }
 0x510   : > { %1409 = vst.msk [vmem:[%s2481_s23 + $0x60] sm:$0xff] %vm1396_vm3, %v1373_v32  ;;  %v1281_v56 = vsub.f32 0.0, %v1263_v58 }
 0x511   : > { %1331 = vst.msk [vmem:[%s2481_s23 + $0x78] sm:$0xff] %vm1315_vm2, %v1282_v33 }
 0x512   : > { %1330 = vst.msk [vmem:[%s2481_s23 + $0x70] sm:$0xff] %vm1315_vm2, %v1281_v56  ;;  %v1379_v60 = vpop.permute.xlu1 %1378 }
 0x513   : > { %1412 = vst.msk [vmem:[%s2481_s23 + $0x78] sm:$0xff] %vm1396_vm3, %v1379_v60  ;;  %v1377_v10 = vpop.permute.xlu0 %1376 }
 0x514   : > { %1411 = vst.msk [vmem:[%s2481_s23 + $0x70] sm:$0xff] %vm1396_vm3, %v1377_v10 }
 0x515   : > { %1956 = shalt.err (!%p1953_p3)
}
 0x516   : > { %s1957_s20 = scalar_lea.hbm %s2711_s16, 2048  ;;  %s1961_s13 = scalar_lea.hbm %s2770_s7, 4096 }
 0x517   : > { %p1958_p4 = scmp.ne.s32.totalorder %s2711_s16, %s1957_s20  ;;  %p1962_p9 = scmp.lt.s32.totalorder %s2711_s16, %s2770_s7 }
 0x518   : > { %p1963_p10 = scmp.lt.s32.totalorder %s1961_s13, %s1957_s20 }
 0x519   : > { %p1959_p7 = pnand %p1958_p4, %p2088_p5 }
 0x51a   : > { %p1964_p11 = por %p1963_p10, %p1962_p9 }
 0x51b   : > { %p1960_p8 = pneg %p1959_p7 }
 0x51d   : > { %p1965_p12 = pnand %p1964_p11, %p1960_p8 }
 0x51f   : > { %1968 = shalt.err (!%p1965_p12)
}
 0x520   : > { %s2008_s9 = smov 128   ;;  %s2009_s14 = smov 8  }
 0x521   : > { %1740 = dma.vmem_to_hbm [thread:$0]  (%p2088_p5), %s2713_s8, 2048, %s2711_s16, %s2723_s28, %s2008_s9, %s2008_s9, %s2009_s14  }
 0x522 PF: > { %p1746_p13 = scmp.ge.s32.totalorder %s2003_s27, 2  ;;  %s1442_s15 = sand.u32 1, %s1991_s24  }
 0x523   : > { %s1443_s17 = scalar_lea.sflag [#allocation3], %s1442_s15 }
 0x524   : > { %p1743_p0 = pnand %p1746_p13, %p2092_p6 }
 0x526   : > { %p1744_p1 = pneg %p1743_p0 }
 0x528   : > { %1986 = dma.done.wait (%p1744_p1), %s1443_s17, 2048  }
 0x529   : > { %1988 = vsyncadd (%p1744_p1), %s1443_s17, 4294965248  ;;  %p17_p2 = scmp.ge.s32.totalorder %s2075_s30, 4   ;;  %s2773_s24 = smov %s1995_s25 }
 0x52a   : > { %s2774_s25 = smov %s1999_s26  ;;  %s2775_s26 = smov %s2086_s10 }
 0x52b   : > { %s2776_s27 = smov %s2075_s30  ;;  %19 = sbr.rel (!%p17_p2) target bundleno = 3 (0x3), region = 83 }
 0x530   :  { %1448 = vsyncpa [#allocation3], 1 }
 0x531   :  { %1450 = vsyncpa [#allocation3 + $0x1], 1 }

</bundles_post_ra>
